<compile_context>
chip_gen: v7x
topology: tpu7x:2x2x1
jax: 0.10.0
libtpu: 0.0.40
codegen_flags: <defaults>
</compile_context>

<pallas_src>
import functools

import jax
import jax.numpy as jnp
from jax.experimental import pallas as pl
from jax.experimental.pallas import tpu as pltpu

LANE = 128
N_LAYERS = 6


def _round_up(n, m):
    return ((n + m - 1) // m) * m


def ae_kernel(*refs, noise_scale, has_noise):
    it = iter(refs)
    x_ref = next(it)
    noise_ref = next(it) if has_noise else None
    param_refs = [next(it) for _ in range(2 * N_LAYERS)]
    xbar_ref = next(it)
    z_ref = next(it)

    x = x_ref[...]
    if has_noise:
        x = x + noise_ref[...] * jnp.float32(noise_scale)

    def dense(h, w_ref, b_ref, relu):
        out = jnp.dot(h.astype(w_ref.dtype), w_ref[...],
                      preferred_element_type=jnp.float32) + b_ref[...]
        return jnp.maximum(out, 0.0) if relu else out

    (w1, b1, w2, b2, w3, b3, w4, b4, w5, b5, w6, b6) = param_refs

    # ----- encoder (z_layer) -----
    h = dense(x, w1, b1, True)
    h = dense(h, w2, b2, True)
    z = dense(h, w3, b3, False)

    # ----- decoder (x_bar_layer) -----
    d = dense(z, w4, b4, True)
    d = dense(d, w5, b5, True)
    x_bar = dense(d, w6, b6, False)

    xbar_ref[...] = x_bar.astype(xbar_ref.dtype)
    z_ref[...] = z.astype(z_ref.dtype)


def pad_params(params, compute_dtype):
    """Zero-pad (W(in,out) f32, b(out,) f32) to 128-multiples.

    Weights are stored in `compute_dtype` (bf16) for the MXU; biases stay f32.
    """
    padded = []
    for w, b in params:
        n_in, n_out = w.shape
        pi, po = _round_up(n_in, LANE), _round_up(n_out, LANE)
        wp = jnp.zeros((pi, po), jnp.float32).at[:n_in, :n_out].set(w)
        bp = jnp.zeros((1, po), jnp.float32).at[0, :n_out].set(b.reshape(-1))
        padded.append((wp.astype(compute_dtype), bp))
    return padded


def ae_forward(x, params, *, noise=None, noise_scale=0.1, tb=128,
               compute_dtype=jnp.bfloat16):
    """params: list of 6 tuples (W (in,out) f32, b (out,) f32), PyTorch Linear
    weights pre-transposed so the kernel computes x @ W + b.

    noise: optional (B, n_input) f32 array of N(0,1) samples (required when
    noise_scale != 0)."""
    B, n_input = x.shape
    n_z = params[2][0].shape[1]
    has_noise = (float(noise_scale) != 0.0)
    if has_noise and noise is None:
        raise ValueError("noise array required when noise_scale != 0")

    padded = pad_params(params, compute_dtype)
    n_in_p = padded[0][0].shape[0]
    n_z_p = padded[2][0].shape[1]
    n_out_p = padded[5][0].shape[1]   # padded n_input (decoder output)

    # Pad batch to a multiple of the batch tile.
    b_pad = _round_up(max(B, 1), tb)
    x_p = jnp.zeros((b_pad, n_in_p), jnp.float32).at[:B, :n_input].set(x)

    # Activations (and noise) move with the grid; weights/biases are resident.
    flat = [x_p]
    in_specs = [pl.BlockSpec((tb, n_in_p), lambda i: (i, 0))]
    if has_noise:
        noise_p = jnp.zeros((b_pad, n_in_p), jnp.float32).at[:B, :n_input].set(noise)
        flat.append(noise_p)
        in_specs.append(pl.BlockSpec((tb, n_in_p), lambda i: (i, 0)))
    for (w, b) in padded:
        flat += [w, b]
        in_specs.append(pl.BlockSpec(w.shape, lambda i: (0, 0)))
        in_specs.append(pl.BlockSpec(b.shape, lambda i: (0, 0)))

    out_shapes = (jax.ShapeDtypeStruct((b_pad, n_out_p), jnp.float32),
                  jax.ShapeDtypeStruct((b_pad, n_z_p), jnp.float32))
    out_specs = (pl.BlockSpec((tb, n_out_p), lambda i: (i, 0)),
                 pl.BlockSpec((tb, n_z_p), lambda i: (i, 0)))

    flops = 2 * b_pad * sum(w.shape[0] * w.shape[1] for w, _ in padded)
    bytes_accessed = (
        x_p.size * x_p.dtype.itemsize * (2 if has_noise else 1)
        + sum(w.size * w.dtype.itemsize + b.size * b.dtype.itemsize
              for w, b in padded)
        + b_pad * (n_out_p + n_z_p) * 4)

    kernel = functools.partial(ae_kernel, noise_scale=float(noise_scale),
                               has_noise=has_noise)

    xbar_p, z_p = pl.pallas_call(
        kernel,
        out_shape=out_shapes,
        grid_spec=pltpu.PrefetchScalarGridSpec(
            num_scalar_prefetch=0,
            grid=(b_pad // tb,),
            in_specs=in_specs,
            out_specs=out_specs,
        ),
        compiler_params=pltpu.CompilerParams(
            dimension_semantics=("parallel",)),
        cost_estimate=pl.CostEstimate(flops=flops, transcendentals=0,
                                      bytes_accessed=bytes_accessed),
    )(*flat)

    return xbar_p[:B, :n_input], z_p[:B, :n_z]


def init_linear(key, n_in, n_out):
    """Deterministic init mimicking torch.nn.Linear (uniform ±1/sqrt(n_in))."""
    kw, kb = jax.random.split(key)
    bound = 1.0 / jnp.sqrt(jnp.float32(n_in))
    w = jax.random.uniform(kw, (n_out, n_in), jnp.float32, -bound, bound)
    b = jax.random.uniform(kb, (n_out,), jnp.float32, -bound, bound)
    return w.T, b   # pre-transposed to (in, out) for x @ W


def ref_forward(x, params, cdt=jnp.bfloat16):
    """Plain-JAX reference mirroring kernel precision (bf16 dot, f32 accumulate)."""
    def dense(h, w, b, relu):
        o = jnp.dot(h.astype(cdt), w.astype(cdt),
                    preferred_element_type=jnp.float32) + b.reshape(1, -1)
        return jnp.maximum(o, 0.0) if relu else o
    (w1, b1), (w2, b2), (w3, b3), (w4, b4), (w5, b5), (w6, b6) = params
    h = dense(x, w1, b1, True)
    h = dense(h, w2, b2, True)
    zz = dense(h, w3, b3, False)
    d = dense(zz, w4, b4, True)
    d = dense(d, w5, b5, True)
    return dense(d, w6, b6, False), zz


if __name__ == "__main__":
    # Module dims: n_input=32, n_enc_1=64, n_enc_2=32, n_z=16, n_dec_2=32, n_dec_3=64
    # (n_enc_3 / n_dec_1 are unused by the PyTorch module's forward.)
    B = 256                      # 2 batch tiles of 128 -> exercises the grid pipeline
    n_input, n_enc_1, n_enc_2, n_z = 32, 64, 32, 16
    n_dec_2, n_dec_3 = 32, 64

    key = jax.random.PRNGKey(0)
    keys = jax.random.split(key, 8)
    layer_dims = [(n_input, n_enc_1), (n_enc_1, n_enc_2), (n_enc_2, n_z),
                  (n_z, n_dec_2), (n_dec_2, n_dec_3), (n_dec_3, n_input)]
    params = [init_linear(keys[i], di, do) for i, (di, do) in enumerate(layer_dims)]
    x = jax.random.normal(keys[6], (B, n_input), jnp.float32)

    # --- 1) deterministic check: noise disabled, compare vs plain-JAX reference.
    x_bar0, z0 = ae_forward(x, params, noise_scale=0.0)
    jax.block_until_ready((x_bar0, z0))
    xb_ref, z_ref_ = ref_forward(x, params)
    assert jnp.allclose(x_bar0, xb_ref, atol=2e-2, rtol=2e-2)
    assert jnp.allclose(z0, z_ref_, atol=2e-2, rtol=2e-2)

    # --- 2) noisy path: x + N(0,1)*0.1 (noise generated in wrapper, fused add
    #        inside the kernel); exact comparison against reference on x+noise.
    noise = jax.random.normal(keys[7], (B, n_input), jnp.float32)
    x_bar, z = ae_forward(x, params, noise=noise, noise_scale=0.1)
    jax.block_until_ready((x_bar, z))
    xb_ref_n, z_ref_n = ref_forward(x + noise * 0.1, params)
    assert x_bar.shape == (B, n_input) and z.shape == (B, n_z)
    assert bool(jnp.all(jnp.isfinite(x_bar))) and bool(jnp.all(jnp.isfinite(z)))
    assert jnp.allclose(x_bar, xb_ref_n, atol=2e-2, rtol=2e-2)
    assert jnp.allclose(z, z_ref_n, atol=2e-2, rtol=2e-2)
    assert float(jnp.max(jnp.abs(z - z0))) > 0.0   # noise actually perturbs z

    print("KERNEL_OK")
</pallas_src>

<mosaic_0001>
module attributes {stable_mosaic.version = 11 : i64} {
  func.func @ae_kernel(%arg0: i32, %arg1: memref<128x128xf32, #tpu.memory_space<vmem>>, %arg2: memref<128x128xbf16, #tpu.memory_space<vmem>>, %arg3: memref<1x128xf32, #tpu.memory_space<vmem>>, %arg4: memref<128x128xbf16, #tpu.memory_space<vmem>>, %arg5: memref<1x128xf32, #tpu.memory_space<vmem>>, %arg6: memref<128x128xbf16, #tpu.memory_space<vmem>>, %arg7: memref<1x128xf32, #tpu.memory_space<vmem>>, %arg8: memref<128x128xbf16, #tpu.memory_space<vmem>>, %arg9: memref<1x128xf32, #tpu.memory_space<vmem>>, %arg10: memref<128x128xbf16, #tpu.memory_space<vmem>>, %arg11: memref<1x128xf32, #tpu.memory_space<vmem>>, %arg12: memref<128x128xbf16, #tpu.memory_space<vmem>>, %arg13: memref<1x128xf32, #tpu.memory_space<vmem>>, %arg14: memref<128x128xf32, #tpu.memory_space<vmem>>, %arg15: memref<128x128xf32, #tpu.memory_space<vmem>>) attributes {dimension_semantics = [#tpu.dimension_semantics<parallel>], iteration_bounds = array<i64: 2>, scalar_prefetch = 0 : i64, scratch_operands = 0 : i64, tpu.core_type = #tpu.core_type<tc>, window_params = [{transform_indices = @transform_0, window_bounds = array<i64: 128, 128>}, {pipeline_mode = #tpu.pipeline_mode<synchronous>, transform_indices = @transform_1, window_bounds = array<i64: 128, 128>}, {pipeline_mode = #tpu.pipeline_mode<synchronous>, transform_indices = @transform_2, window_bounds = array<i64: 1, 128>}, {pipeline_mode = #tpu.pipeline_mode<synchronous>, transform_indices = @transform_3, window_bounds = array<i64: 128, 128>}, {pipeline_mode = #tpu.pipeline_mode<synchronous>, transform_indices = @transform_4, window_bounds = array<i64: 1, 128>}, {pipeline_mode = #tpu.pipeline_mode<synchronous>, transform_indices = @transform_5, window_bounds = array<i64: 128, 128>}, {pipeline_mode = #tpu.pipeline_mode<synchronous>, transform_indices = @transform_6, window_bounds = array<i64: 1, 128>}, {pipeline_mode = #tpu.pipeline_mode<synchronous>, transform_indices = @transform_7, window_bounds = array<i64: 128, 128>}, {pipeline_mode = #tpu.pipeline_mode<synchronous>, transform_indices = @transform_8, window_bounds = array<i64: 1, 128>}, {pipeline_mode = #tpu.pipeline_mode<synchronous>, transform_indices = @transform_9, window_bounds = array<i64: 128, 128>}, {pipeline_mode = #tpu.pipeline_mode<synchronous>, transform_indices = @transform_10, window_bounds = array<i64: 1, 128>}, {pipeline_mode = #tpu.pipeline_mode<synchronous>, transform_indices = @transform_11, window_bounds = array<i64: 128, 128>}, {pipeline_mode = #tpu.pipeline_mode<synchronous>, transform_indices = @transform_12, window_bounds = array<i64: 1, 128>}, {transform_indices = @transform_13, window_bounds = array<i64: 128, 128>}, {transform_indices = @transform_14, window_bounds = array<i64: 128, 128>}]} {
    %c0 = arith.constant 0 : index
    %c0_0 = arith.constant 0 : index
    %0 = vector.load %arg1[%c0, %c0_0] : memref<128x128xf32, #tpu.memory_space<vmem>>, vector<128x128xf32>
    %1 = arith.truncf %0 : vector<128x128xf32> to vector<128x128xbf16>
    %c0_1 = arith.constant 0 : index
    %c0_2 = arith.constant 0 : index
    %2 = vector.load %arg2[%c0_1, %c0_2] : memref<128x128xbf16, #tpu.memory_space<vmem>>, vector<128x128xbf16>
    %cst = arith.constant dense<0.000000e+00> : vector<128x128xf32>
    %3 = tpu.matmul %1, %2, %cst {dimension_numbers = #tpu.dot_dimension_numbers<[1], [0], [0], [1], [0, 0, 1, 1], [], []>} : vector<128x128xbf16>, vector<128x128xbf16>, vector<128x128xf32> -> vector<128x128xf32>
    %c0_3 = arith.constant 0 : index
    %c0_4 = arith.constant 0 : index
    %4 = vector.load %arg3[%c0_3, %c0_4] : memref<1x128xf32, #tpu.memory_space<vmem>>, vector<1x128xf32>
    %5 = vector.broadcast %4 : vector<1x128xf32> to vector<128x128xf32>
    %6 = arith.addf %3, %5 : vector<128x128xf32>
    %cst_5 = arith.constant 0.000000e+00 : f32
    %7 = vector.broadcast %cst_5 : f32 to vector<128x128xf32>
    %8 = arith.maximumf %6, %7 : vector<128x128xf32>
    %9 = arith.truncf %8 : vector<128x128xf32> to vector<128x128xbf16>
    %c0_6 = arith.constant 0 : index
    %c0_7 = arith.constant 0 : index
    %10 = vector.load %arg4[%c0_6, %c0_7] : memref<128x128xbf16, #tpu.memory_space<vmem>>, vector<128x128xbf16>
    %cst_8 = arith.constant dense<0.000000e+00> : vector<128x128xf32>
    %11 = tpu.matmul %9, %10, %cst_8 {dimension_numbers = #tpu.dot_dimension_numbers<[1], [0], [0], [1], [0, 0, 1, 1], [], []>} : vector<128x128xbf16>, vector<128x128xbf16>, vector<128x128xf32> -> vector<128x128xf32>
    %c0_9 = arith.constant 0 : index
    %c0_10 = arith.constant 0 : index
    %12 = vector.load %arg5[%c0_9, %c0_10] : memref<1x128xf32, #tpu.memory_space<vmem>>, vector<1x128xf32>
    %13 = vector.broadcast %12 : vector<1x128xf32> to vector<128x128xf32>
    %14 = arith.addf %11, %13 : vector<128x128xf32>
    %cst_11 = arith.constant 0.000000e+00 : f32
    %15 = vector.broadcast %cst_11 : f32 to vector<128x128xf32>
    %16 = arith.maximumf %14, %15 : vector<128x128xf32>
    %17 = arith.truncf %16 : vector<128x128xf32> to vector<128x128xbf16>
    %c0_12 = arith.constant 0 : index
    %c0_13 = arith.constant 0 : index
    %18 = vector.load %arg6[%c0_12, %c0_13] : memref<128x128xbf16, #tpu.memory_space<vmem>>, vector<128x128xbf16>
    %cst_14 = arith.constant dense<0.000000e+00> : vector<128x128xf32>
    %19 = tpu.matmul %17, %18, %cst_14 {dimension_numbers = #tpu.dot_dimension_numbers<[1], [0], [0], [1], [0, 0, 1, 1], [], []>} : vector<128x128xbf16>, vector<128x128xbf16>, vector<128x128xf32> -> vector<128x128xf32>
    %c0_15 = arith.constant 0 : index
    %c0_16 = arith.constant 0 : index
    %20 = vector.load %arg7[%c0_15, %c0_16] : memref<1x128xf32, #tpu.memory_space<vmem>>, vector<1x128xf32>
    %21 = vector.broadcast %20 : vector<1x128xf32> to vector<128x128xf32>
    %22 = arith.addf %19, %21 : vector<128x128xf32>
    %23 = arith.truncf %22 : vector<128x128xf32> to vector<128x128xbf16>
    %c0_17 = arith.constant 0 : index
    %c0_18 = arith.constant 0 : index
    %24 = vector.load %arg8[%c0_17, %c0_18] : memref<128x128xbf16, #tpu.memory_space<vmem>>, vector<128x128xbf16>
    %cst_19 = arith.constant dense<0.000000e+00> : vector<128x128xf32>
    %25 = tpu.matmul %23, %24, %cst_19 {dimension_numbers = #tpu.dot_dimension_numbers<[1], [0], [0], [1], [0, 0, 1, 1], [], []>} : vector<128x128xbf16>, vector<128x128xbf16>, vector<128x128xf32> -> vector<128x128xf32>
    %c0_20 = arith.constant 0 : index
    %c0_21 = arith.constant 0 : index
    %26 = vector.load %arg9[%c0_20, %c0_21] : memref<1x128xf32, #tpu.memory_space<vmem>>, vector<1x128xf32>
    %27 = vector.broadcast %26 : vector<1x128xf32> to vector<128x128xf32>
    %28 = arith.addf %25, %27 : vector<128x128xf32>
    %cst_22 = arith.constant 0.000000e+00 : f32
    %29 = vector.broadcast %cst_22 : f32 to vector<128x128xf32>
    %30 = arith.maximumf %28, %29 : vector<128x128xf32>
    %31 = arith.truncf %30 : vector<128x128xf32> to vector<128x128xbf16>
    %c0_23 = arith.constant 0 : index
    %c0_24 = arith.constant 0 : index
    %32 = vector.load %arg10[%c0_23, %c0_24] : memref<128x128xbf16, #tpu.memory_space<vmem>>, vector<128x128xbf16>
    %cst_25 = arith.constant dense<0.000000e+00> : vector<128x128xf32>
    %33 = tpu.matmul %31, %32, %cst_25 {dimension_numbers = #tpu.dot_dimension_numbers<[1], [0], [0], [1], [0, 0, 1, 1], [], []>} : vector<128x128xbf16>, vector<128x128xbf16>, vector<128x128xf32> -> vector<128x128xf32>
    %c0_26 = arith.constant 0 : index
    %c0_27 = arith.constant 0 : index
    %34 = vector.load %arg11[%c0_26, %c0_27] : memref<1x128xf32, #tpu.memory_space<vmem>>, vector<1x128xf32>
    %35 = vector.broadcast %34 : vector<1x128xf32> to vector<128x128xf32>
    %36 = arith.addf %33, %35 : vector<128x128xf32>
    %cst_28 = arith.constant 0.000000e+00 : f32
    %37 = vector.broadcast %cst_28 : f32 to vector<128x128xf32>
    %38 = arith.maximumf %36, %37 : vector<128x128xf32>
    %39 = arith.truncf %38 : vector<128x128xf32> to vector<128x128xbf16>
    %c0_29 = arith.constant 0 : index
    %c0_30 = arith.constant 0 : index
    %40 = vector.load %arg12[%c0_29, %c0_30] : memref<128x128xbf16, #tpu.memory_space<vmem>>, vector<128x128xbf16>
    %cst_31 = arith.constant dense<0.000000e+00> : vector<128x128xf32>
    %41 = tpu.matmul %39, %40, %cst_31 {dimension_numbers = #tpu.dot_dimension_numbers<[1], [0], [0], [1], [0, 0, 1, 1], [], []>} : vector<128x128xbf16>, vector<128x128xbf16>, vector<128x128xf32> -> vector<128x128xf32>
    %c0_32 = arith.constant 0 : index
    %c0_33 = arith.constant 0 : index
    %42 = vector.load %arg13[%c0_32, %c0_33] : memref<1x128xf32, #tpu.memory_space<vmem>>, vector<1x128xf32>
    %43 = vector.broadcast %42 : vector<1x128xf32> to vector<128x128xf32>
    %44 = arith.addf %41, %43 : vector<128x128xf32>
    %c0_34 = arith.constant 0 : index
    %c0_35 = arith.constant 0 : index
    %45 = vector.load %arg14[%c0_34, %c0_35] : memref<128x128xf32, #tpu.memory_space<vmem>>, vector<128x128xf32>
    tpu.vector_store %arg14[%c0_34, %c0_35], %44 {strides = array<i32>} : memref<128x128xf32, #tpu.memory_space<vmem>>, vector<128x128xf32>,
    %c0_36 = arith.constant 0 : index
    %c0_37 = arith.constant 0 : index
    %46 = vector.load %arg15[%c0_36, %c0_37] : memref<128x128xf32, #tpu.memory_space<vmem>>, vector<128x128xf32>
    tpu.vector_store %arg15[%c0_36, %c0_37], %22 {strides = array<i32>} : memref<128x128xf32, #tpu.memory_space<vmem>>, vector<128x128xf32>,
    return
  }
  func.func @transform_0(%arg0: i32) -> (i32, i32) {
    %c0_i32 = arith.constant 0 : i32
    %c0_i32_0 = arith.constant 0 : i32
    return %arg0, %c0_i32 : i32, i32
  }
  func.func @transform_1(%arg0: i32) -> (i32, i32) {
    %c0_i32 = arith.constant 0 : i32
    %c0_i32_0 = arith.constant 0 : i32
    %c0_i32_1 = arith.constant 0 : i32
    return %c0_i32, %c0_i32_0 : i32, i32
  }
  func.func @transform_2(%arg0: i32) -> (i32, i32) {
    %c0_i32 = arith.constant 0 : i32
    %c0_i32_0 = arith.constant 0 : i32
    %c0_i32_1 = arith.constant 0 : i32
    return %c0_i32, %c0_i32_0 : i32, i32
  }
  func.func @transform_3(%arg0: i32) -> (i32, i32) {
    %c0_i32 = arith.constant 0 : i32
    %c0_i32_0 = arith.constant 0 : i32
    %c0_i32_1 = arith.constant 0 : i32
    return %c0_i32, %c0_i32_0 : i32, i32
  }
  func.func @transform_4(%arg0: i32) -> (i32, i32) {
    %c0_i32 = arith.constant 0 : i32
    %c0_i32_0 = arith.constant 0 : i32
    %c0_i32_1 = arith.constant 0 : i32
    return %c0_i32, %c0_i32_0 : i32, i32
  }
  func.func @transform_5(%arg0: i32) -> (i32, i32) {
    %c0_i32 = arith.constant 0 : i32
    %c0_i32_0 = arith.constant 0 : i32
    %c0_i32_1 = arith.constant 0 : i32
    return %c0_i32, %c0_i32_0 : i32, i32
  }
  func.func @transform_6(%arg0: i32) -> (i32, i32) {
    %c0_i32 = arith.constant 0 : i32
    %c0_i32_0 = arith.constant 0 : i32
    %c0_i32_1 = arith.constant 0 : i32
    return %c0_i32, %c0_i32_0 : i32, i32
  }
  func.func @transform_7(%arg0: i32) -> (i32, i32) {
    %c0_i32 = arith.constant 0 : i32
    %c0_i32_0 = arith.constant 0 : i32
    %c0_i32_1 = arith.constant 0 : i32
    return %c0_i32, %c0_i32_0 : i32, i32
  }
  func.func @transform_8(%arg0: i32) -> (i32, i32) {
    %c0_i32 = arith.constant 0 : i32
    %c0_i32_0 = arith.constant 0 : i32
    %c0_i32_1 = arith.constant 0 : i32
    return %c0_i32, %c0_i32_0 : i32, i32
  }
  func.func @transform_9(%arg0: i32) -> (i32, i32) {
    %c0_i32 = arith.constant 0 : i32
    %c0_i32_0 = arith.constant 0 : i32
    %c0_i32_1 = arith.constant 0 : i32
    return %c0_i32, %c0_i32_0 : i32, i32
  }
  func.func @transform_10(%arg0: i32) -> (i32, i32) {
    %c0_i32 = arith.constant 0 : i32
    %c0_i32_0 = arith.constant 0 : i32
    %c0_i32_1 = arith.constant 0 : i32
    return %c0_i32, %c0_i32_0 : i32, i32
  }
  func.func @transform_11(%arg0: i32) -> (i32, i32) {
    %c0_i32 = arith.constant 0 : i32
    %c0_i32_0 = arith.constant 0 : i32
    %c0_i32_1 = arith.constant 0 : i32
    return %c0_i32, %c0_i32_0 : i32, i32
  }
  func.func @transform_12(%arg0: i32) -> (i32, i32) {
    %c0_i32 = arith.constant 0 : i32
    %c0_i32_0 = arith.constant 0 : i32
    %c0_i32_1 = arith.constant 0 : i32
    return %c0_i32, %c0_i32_0 : i32, i32
  }
  func.func @transform_13(%arg0: i32) -> (i32, i32) {
    %c0_i32 = arith.constant 0 : i32
    %c0_i32_0 = arith.constant 0 : i32
    return %arg0, %c0_i32 : i32, i32
  }
  func.func @transform_14(%arg0: i32) -> (i32, i32) {
    %c0_i32 = arith.constant 0 : i32
    %c0_i32_0 = arith.constant 0 : i32
    return %arg0, %c0_i32 : i32, i32
  }
}

</mosaic_0001>

<bundles_post_ra>
// kernel: tpu_custom_call.1
= control target key start
LH: loop header
LB: loop body
LE: loop exit
PB: predicated region body
PF: predicated region fallthrough
CT: control target
= control target key end

     0   :  { %s3357_s0 = inlined_call_operand.hbm [shape: f32[256,128], index: 0, kind: input, shape index: {}]   ;;  %s3358_s1 = inlined_call_operand.hbm [shape: bf16[128,128], index: 1, kind: input, shape index: {}]   ;;  %s3359_s2 = inlined_call_operand.vmem [shape: f32[1,128], index: 2, kind: input, shape index: {}]   ;;  %s3360_s3 = inlined_call_operand.hbm [shape: bf16[128,128], index: 3, kind: input, shape index: {}]   ;;  %s3361_s4 = inlined_call_operand.vmem [shape: f32[1,128], index: 4, kind: input, shape index: {}]   ;;  %s3362_s5 = inlined_call_operand.hbm [shape: bf16[128,128], index: 5, kind: input, shape index: {}]   ;;  %s3363_s6 = inlined_call_operand.vmem [shape: f32[1,128], index: 6, kind: input, shape index: {}]   ;;  %s3364_s7 = inlined_call_operand.hbm [shape: bf16[128,128], index: 7, kind: input, shape index: {}]   ;;  %s3365_s8 = inlined_call_operand.vmem [shape: f32[1,128], index: 8, kind: input, shape index: {}]   ;;  %s3366_s9 = inlined_call_operand.hbm [shape: bf16[128,128], index: 9, kind: input, shape index: {}]   ;;  %s3367_s10 = inlined_call_operand.vmem [shape: f32[1,128], index: 10, kind: input, shape index: {}]   ;;  %s3368_s11 = inlined_call_operand.hbm [shape: bf16[128,128], index: 11, kind: input, shape index: {}]   ;;  %s3369_s12 = inlined_call_operand.vmem [shape: f32[1,128], index: 12, kind: input, shape index: {}]   ;;  %s3370_s13 = inlined_call_operand.hbm [shape: f32[256,128], index: 13, kind: output, shape index: {0}]   ;;  %s3371_s14 = inlined_call_operand.hbm [shape: f32[256,128], index: 14, kind: output, shape index: {1}]  }
   0x1   :  { %3379 = sst [smem:[#allocation23_spill]] %s3358_s1 }
   0x2   :  { %3380 = sst [smem:[#allocation24_spill]] %s3363_s6 }
   0x3   :  { %3381 = sst [smem:[#allocation25_spill]] %s3365_s8 }
   0x4   :  { %3382 = sst [smem:[#allocation26_spill]] %s3367_s10 }
   0x5   :  { %3383 = sst [smem:[#allocation27_spill]] %s3369_s12 }
   0x6   :  { %3384 = sst [smem:[#allocation28_spill]] %s3370_s13 }
   0x7   :  { %3385 = sst [smem:[#allocation29_spill]] %s3371_s14 }
   0x8   :  { %20 = vsyncpa [#allocation3], 0 }
   0x9   :  { %22 = vsyncpa [#allocation3 + $0x1], 0 }
   0xa   :  { %23 = vsyncpa [#allocation6], 0 }
   0xb   :  { %24 = vsyncpa [#allocation9], 0 }
   0xc   :  { %25 = vsyncpa [#allocation12], 0 }
   0xd   :  { %26 = vsyncpa [#allocation4], 0 }
   0xe   :  { %28 = vsyncpa [#allocation4 + $0x1], 0 }
   0xf   :  { %29 = vsyncpa [#allocation16], 0 }
  0x10   :  { %31 = vsyncpa [#allocation16 + $0x1], 0  ;;  %s2894_s29 = smov 0   ;;  %s2896_s30 = smov 0  }
  0x11   :  { %s2898_s15 = smov 0   ;;  %s2900_s16 = smov 0  }
  0x12 LB: > { %s2804_s17 = smov [#allocation5]   ;;  %s2915_s19 = sadd.s32 4294967295, %s2802_s16   ;;  %s2802_s16 = sphi %s2900_s16, %s3417_s16   ;;  %s2798_s15 = sphi %s2898_s15, %s3416_s15   ;;  %s2794_s30 = sphi %s2896_s30, %s3415_s30   ;;  %s2790_s29 = sphi %s2894_s29, %s3414_s29  }
  0x13   : > { %s384_s18 = sshll.u32 %s2804_s17, 4  ;;  %p1954_p0 = scmp.ge.s32.totalorder %s2802_s16, 1  ;;  %s2920_s18 = int_to_ptr.vmem [resolvable:$true] %s384_s18 }
  0x14   : > { %p3374_p1 = scmp.eq.s32.totalorder %s2915_s19, 0  ;;  %p372_p2 = scmp.lt.s32.totalorder %s2802_s16, 3 }
  0x15   : > { %s2805_s21 = smov [#allocation8]   ;;  %s2806_s24 = smov [#allocation11]  }
  0x16   : > { %p2922_p3 = pnand %p1954_p0, %p372_p2  ;;  %s416_s22 = sshll.u32 %s2805_s21, 4  ;;  %s2935_s22 = int_to_ptr.vmem [resolvable:$true] %s416_s22 }
  0x17   : > { %s448_s25 = sshll.u32 %s2806_s24, 4  ;;  %s3388_s1 = sld [smem:[#allocation23_spill]]  ;;  %s2937_s25 = int_to_ptr.vmem [resolvable:$true] %s448_s25 }
  0x18   : > { %s3386_s20 = scalar_select %p2922_p3, 1, 0 }
  0x19   : > { %p2358_p5 = pneg %p2922_p3 }
  0x1b   : > { %p2931_p6 = pnand %p2358_p5, %p3374_p1 }
  0x1d   : > { %s2494_s28 = scalar_lea.hbm %s3388_s1, 1024  ;;  %p2947_p8 = pneg %p2931_p6 }
  0x1e   : > { %p2495_p7 = scmp.ne.s32.totalorder %s3388_s1, %s2494_s28  ;;  %p2501_p11 = scmp.lt.u32.totalorder %s2494_s28, %s3388_s1 }
  0x20   : > { %p2497_p9 = pnand %p2947_p8, %p2495_p7 }
  0x22   : > { %p2498_p10 = pneg %p2497_p9 }
  0x24   : > { %p2503_p12 = pnand %p2501_p11, %p2498_p10 }
  0x26   : > { %2506 = shalt.err (!%p2503_p12)
}
  0x27   : > { %s2507_s13 = scalar_lea.vmem %s2920_s18, 1024  ;;  %p2515_p5 = scmp.lt.s32.totalorder %s2920_s18, %s2920_s18 }
  0x28   : > { %p2508_p13 = scmp.ne.s32.totalorder %s2920_s18, %s2507_s13  ;;  %p2516_p4 = scmp.lt.s32.totalorder %s2507_s13, %s2507_s13 }
  0x2a   : > { %p2510_p0 = pnand %p2508_p13, %p2947_p8  ;;  %p2517_p7 = por %p2516_p4, %p2515_p5 }
  0x2c   : > { %p2511_p2 = pneg %p2510_p0 }
  0x2e   : > { %p2518_p9 = pnand %p2517_p7, %p2511_p2 }
  0x30   : > { %2521 = shalt.err (!%p2518_p9)
}
  0x31   : > { %s2807_s26 = smov 64   ;;  %s2808_s12 = smov 4  }
  0x32   : > { %2361 = dma.hbm_to_vmem [thread:$0]  (!%p2931_p6), %s3388_s1, 1024, %s2920_s18, [#allocation6], %s2807_s26, %s2807_s26, %s2808_s12  }
  0x33   : > { %s2522_s13 = scalar_lea.hbm %s3362_s5, 1024 }
  0x34   : > { %p2523_p4 = scmp.ne.s32.totalorder %s3362_s5, %s2522_s13  ;;  %p2529_p12 = scmp.lt.u32.totalorder %s2522_s13, %s3362_s5 }
  0x36   : > { %p2525_p10 = pnand %p2523_p4, %p2947_p8 }
  0x38   : > { %p2526_p11 = pneg %p2525_p10 }
  0x3a   : > { %p2531_p13 = pnand %p2529_p12, %p2526_p11 }
  0x3c   : > { %2534 = shalt.err (!%p2531_p13)
}
  0x3d   : > { %s2535_s18 = scalar_lea.vmem %s2935_s22, 1024  ;;  %p2543_p7 = scmp.lt.s32.totalorder %s2935_s22, %s2935_s22 }
  0x3e   : > { %p2536_p0 = scmp.ne.s32.totalorder %s2935_s22, %s2535_s18  ;;  %p2544_p9 = scmp.lt.s32.totalorder %s2535_s18, %s2535_s18 }
  0x40   : > { %p2538_p2 = pnand %p2536_p0, %p2947_p8  ;;  %p2545_p4 = por %p2544_p9, %p2543_p7 }
  0x42   : > { %p2539_p5 = pneg %p2538_p2 }
  0x44   : > { %p2546_p10 = pnand %p2545_p4, %p2539_p5 }
  0x46   : > { %2549 = shalt.err (!%p2546_p10)
}
  0x47   : > { %2367 = dma.hbm_to_vmem [thread:$0]  (!%p2931_p6), %s3362_s5, 1024, %s2935_s22, [#allocation9], %s2807_s26, %s2807_s26, %s2808_s12  }
  0x48   : > { %s2550_s27 = scalar_lea.hbm %s3366_s9, 1024 }
  0x49   : > { %p2551_p11 = scmp.ne.s32.totalorder %s3366_s9, %s2550_s27  ;;  %p2557_p0 = scmp.lt.u32.totalorder %s2550_s27, %s3366_s9 }
  0x4b   : > { %p2553_p12 = pnand %p2551_p11, %p2947_p8 }
  0x4d   : > { %p2554_p13 = pneg %p2553_p12 }
  0x4f   : > { %p2559_p2 = pnand %p2557_p0, %p2554_p13 }
  0x51   : > { %2562 = shalt.err (!%p2559_p2)
}
  0x52   : > { %s2563_s22 = scalar_lea.vmem %s2937_s25, 1024  ;;  %p2571_p4 = scmp.lt.s32.totalorder %s2937_s25, %s2937_s25 }
  0x53   : > { %p2564_p5 = scmp.ne.s32.totalorder %s2937_s25, %s2563_s22  ;;  %p2572_p10 = scmp.lt.s32.totalorder %s2563_s22, %s2563_s22 }
  0x55   : > { %p2566_p7 = pnand %p2564_p5, %p2947_p8  ;;  %p2573_p11 = por %p2572_p10, %p2571_p4 }
  0x57   : > { %p2567_p9 = pneg %p2566_p7 }
  0x59   : > { %p2574_p12 = pnand %p2573_p11, %p2567_p9 }
  0x5b   : > { %2577 = shalt.err (!%p2574_p12)
}
  0x5c   : > { %2373 = dma.hbm_to_vmem [thread:$0]  (!%p2931_p6), %s3366_s9, 1024, %s2937_s25, [#allocation12], %s2807_s26, %s2807_s26, %s2808_s12  }
  0x5d   : > { %s2809_s8 = smov [#allocation7]   ;;  %s2810_s14 = smov [#allocation10]  }
  0x5e   : > { %s400_s10 = sshll.u32 %s2809_s8, 4  ;;  %s432_s27 = sshll.u32 %s2810_s14, 4  ;;  %s401_s10 = int_to_ptr.vmem [resolvable:$true] %s400_s10  ;;  %s433_s27 = int_to_ptr.vmem [resolvable:$true] %s432_s27 }
  0x5f   : > { %s2578_s24 = scalar_lea.hbm %s3360_s3, 1024 }
  0x60   : > { %p2579_p13 = scmp.ne.s32.totalorder %s3360_s3, %s2578_s24  ;;  %p2585_p5 = scmp.lt.u32.totalorder %s2578_s24, %s3360_s3 }
  0x62   : > { %p2581_p0 = pnand %p2579_p13, %p2947_p8 }
  0x64   : > { %p2582_p2 = pneg %p2581_p0 }
  0x66   : > { %p2587_p7 = pnand %p2585_p5, %p2582_p2 }
  0x68   : > { %2590 = shalt.err (!%p2587_p7)
}
  0x69   : > { %s2591_s25 = scalar_lea.vmem %s401_s10, 1024  ;;  %p2599_p11 = scmp.lt.s32.totalorder %s401_s10, %s401_s10 }
  0x6a   : > { %p2592_p9 = scmp.ne.s32.totalorder %s401_s10, %s2591_s25  ;;  %p2600_p12 = scmp.lt.s32.totalorder %s2591_s25, %s2591_s25 }
  0x6c   : > { %p2594_p4 = pnand %p2592_p9, %p2947_p8  ;;  %p2601_p1 = por %p2600_p12, %p2599_p11 }
  0x6e   : > { %p2595_p10 = pneg %p2594_p4 }
  0x70   : > { %p2602_p3 = pnand %p2601_p1, %p2595_p10 }
  0x72   : > { %2605 = shalt.err (!%p2602_p3)
}
  0x73   : > { %2364 = dma.hbm_to_vmem [thread:$0]  (!%p2931_p6), %s3360_s3, 1024, %s401_s10, [#allocation6], %s2807_s26, %s2807_s26, %s2808_s12  }
  0x74   : > { %s2606_s28 = scalar_lea.hbm %s3364_s7, 1024 }
  0x75   : > { %p2607_p1 = scmp.ne.s32.totalorder %s3364_s7, %s2606_s28  ;;  %p2613_p0 = scmp.lt.u32.totalorder %s2606_s28, %s3364_s7 }
  0x77   : > { %p2609_p3 = pnand %p2607_p1, %p2947_p8 }
  0x79   : > { %p2610_p13 = pneg %p2609_p3 }
  0x7b   : > { %p2615_p2 = pnand %p2613_p0, %p2610_p13 }
  0x7d   : > { %2618 = shalt.err (!%p2615_p2)
}
  0x7e   : > { %s2619_s18 = scalar_lea.vmem %s433_s27, 1024  ;;  %p2627_p4 = scmp.lt.s32.totalorder %s433_s27, %s433_s27 }
  0x7f   : > { %p2620_p5 = scmp.ne.s32.totalorder %s433_s27, %s2619_s18  ;;  %p2628_p10 = scmp.lt.s32.totalorder %s2619_s18, %s2619_s18 }
  0x81   : > { %p2622_p7 = pnand %p2620_p5, %p2947_p8  ;;  %p2629_p11 = por %p2628_p10, %p2627_p4 }
  0x83   : > { %p2623_p9 = pneg %p2622_p7 }
  0x85   : > { %p2630_p12 = pnand %p2629_p11, %p2623_p9 }
  0x87   : > { %2633 = shalt.err (!%p2630_p12)
}
  0x88   : > { %2370 = dma.hbm_to_vmem [thread:$0]  (!%p2931_p6), %s3364_s7, 1024, %s433_s27, [#allocation9], %s2807_s26, %s2807_s26, %s2808_s12  }
  0x89   : > { %s2811_s1 = smov [#allocation13]   ;;  %s2634_s28 = scalar_lea.hbm %s3368_s11, 1024 }
  0x8a   : > { %s464_s6 = sshll.u32 %s2811_s1, 4  ;;  %p2635_p1 = scmp.ne.s32.totalorder %s3368_s11, %s2634_s28  ;;  %s465_s6 = int_to_ptr.vmem [resolvable:$true] %s464_s6 }
  0x8b   : > { %p2641_p0 = scmp.lt.u32.totalorder %s2634_s28, %s3368_s11 }
  0x8c   : > { %p2637_p3 = pnand %p2635_p1, %p2947_p8 }
  0x8e   : > { %p2638_p13 = pneg %p2637_p3 }
  0x90   : > { %p2643_p2 = pnand %p2641_p0, %p2638_p13 }
  0x92   : > { %2646 = shalt.err (!%p2643_p2)
}
  0x93   : > { %s2647_s27 = scalar_lea.vmem %s465_s6, 1024  ;;  %p2655_p4 = scmp.lt.s32.totalorder %s465_s6, %s465_s6 }
  0x94   : > { %p2648_p5 = scmp.ne.s32.totalorder %s465_s6, %s2647_s27  ;;  %p2656_p10 = scmp.lt.s32.totalorder %s2647_s27, %s2647_s27 }
  0x96   : > { %p2650_p7 = pnand %p2648_p5, %p2947_p8  ;;  %p2657_p11 = por %p2656_p10, %p2655_p4 }
  0x98   : > { %p2651_p9 = pneg %p2650_p7 }
  0x9a   : > { %p2658_p12 = pnand %p2657_p11, %p2651_p9 }
  0x9c   : > { %2661 = shalt.err (!%p2658_p12)
}
  0x9d   : > { %2376 = dma.hbm_to_vmem [thread:$0]  (!%p2931_p6), %s3368_s11, 1024, %s465_s6, [#allocation12], %s2807_s26, %s2807_s26, %s2808_s12  }
  0x9e   : > { %s1953_s23 = sadd.s32 4294967294, %s2802_s16   ;;  %s3088_s21 = sadd.s32 1, %s2802_s16  }
  0x9f   : > { %s41_s25 = ssub.s32 %s2802_s16, %s3088_s21  ;;  %s44_s1 = sadd.s32 1, %s2798_s15 }
  0xa0   : > { %p42_p8 = scmp.eq.s32.totalorder %s41_s25, 0  ;;  %p51_p1 = scmp.ne.s32.totalorder %s2798_s15, %s2794_s30 }
  0xa1   : > { %p52_p3 = scmp.eq.s32.totalorder %s2802_s16, 0  ;;  %p57_p13 = scmp.ne.s32.totalorder %s2794_s30, %s2790_s29 }
  0xa2   : > { %s3099_s8 = scalar_select %p42_p8, %s2798_s15, %s44_s1  }
  0xa3   : > { %p3101_p0 = por %p52_p3, %p51_p1  ;;  %p3391_p2 = scmp.eq.s32.totalorder %s2915_s19, 0 }
  0xa4   : > { %p333_p5 = scmp.eq.s32.totalorder %s2915_s19, 1  ;;  %p339_p7 = scmp.eq.s32.totalorder %s1953_s23, 1 }
  0xa5   : > { %p3107_p6 = por %p3391_p2, %p57_p13  ;;  %p2394_p9 = scmp.lt.s32.totalorder %s2802_s16, 2 }
  0xa6   : > { %s481_s12 = sand.u32 1, %s2798_s15   ;;  %p3114_p4 = por %p333_p5, %p51_p1 }
  0xa7   : > { %p3118_p10 = por %p339_p7, %p57_p13  ;;  %s1962_s17 = sshll.u32 %s481_s12, 7 }
  0xa8   : > { %s3393_s6 = scalar_select %p3114_p4, 1, 0 }
  0xa9   : > { %s3394_s28 = scalar_select %p3118_p10, 1, 0 }
  0xaa   : > { %s2037_s24 = sshll.u32 %s2802_s16, 11  ;;  %s485_s18 = scalar_lea.vmem [#allocation2], %s1962_s17 }
  0xab   : > { %s3126_s27 = scalar_lea.hbm %s3357_s0, %s2037_s24  ;;  %s492_s10 = sshll.u32 %s485_s18, 4  ;;  %s3128_s10 = int_to_ptr.vmem [resolvable:$true] %s492_s10 }
  0xac   : > { %p3132_p11 = pnand %p2394_p9, %p3101_p0  ;;  %s3136_s25 = scalar_lea.sflag [#allocation3], %s481_s12 }
  0xad   : > { %s2662_s1 = scalar_lea.hbm %s3126_s27, 2048  ;;  %s2667_s14 = scalar_lea.hbm %s3357_s0, 4096 }
  0xae   : > { %p2663_p12 = scmp.ne.s32.totalorder %s3126_s27, %s2662_s1  ;;  %p2664_p8 = pneg %p3132_p11 }
  0xaf   : > { %p2668_p13 = scmp.lt.u32.totalorder %s3126_s27, %s3357_s0  ;;  %p2669_p0 = scmp.lt.u32.totalorder %s2667_s14, %s2662_s1 }
  0xb0   : > { %p2665_p1 = pnand %p2664_p8, %p2663_p12  ;;  %p2671_p5 = scmp.lt.u32.totalorder %s2662_s1, %s3126_s27 }
  0xb1   : > { %p2670_p2 = por %p2669_p0, %p2668_p13 }
  0xb2   : > { %p2666_p3 = pneg %p2665_p1 }
  0xb3   : > { %p2672_p7 = por %p2671_p5, %p2670_p2 }
  0xb5   : > { %p2673_p9 = pnand %p2672_p7, %p2666_p3 }
  0xb7   : > { %2676 = shalt.err (!%p2673_p9)
}
  0xb8   : > { %s2677_s12 = scalar_lea.vmem %s3128_s10, 2048  ;;  %s2812_s18 = smov [#allocation2]  }
  0xb9   : > { %p2678_p12 = scmp.ne.s32.totalorder %s3128_s10, %s2677_s12  ;;  %s2682_s17 = sshll.u32 %s2812_s18, 4  ;;  %s2683_s17 = int_to_ptr.vmem [resolvable:$false] %s2682_s17 }
  0xba   : > { %s2684_s24 = scalar_lea.vmem %s2683_s17, 4096  ;;  %p2685_p4 = scmp.lt.s32.totalorder %s3128_s10, %s2683_s17 }
  0xbb   : > { %p2680_p1 = pnand %p2678_p12, %p2664_p8  ;;  %p2686_p13 = scmp.lt.s32.totalorder %s2684_s24, %s2677_s12 }
  0xbd   : > { %p2681_p10 = pneg %p2680_p1  ;;  %p2687_p0 = por %p2686_p13, %p2685_p4 }
  0xbf   : > { %p2688_p2 = pnand %p2687_p0, %p2681_p10 }
  0xc1   : > { %2691 = shalt.err (!%p2688_p2)
}
  0xc2   : > { %s2813_s1 = smov 128   ;;  %s2814_s14 = smov 8  }
  0xc3   : > { %2380 = dma.hbm_to_vmem [thread:$0]  (!%p3132_p11), %s3126_s27, 2048, %s3128_s10, %s3136_s25, %s2813_s1, %s2813_s1, %s2814_s14  }
  0xc4   : > { %p3396_p8 = scmp.ne.s32.totalorder %s3386_s20, 0 }
  0xc5   : > { %s3167_s13 = sand.u32 (!%p3396_p8), 1, %s2794_s30  }
  0xc6   : > { %504 = sbr.rel (%p3396_p8) target bundleno = 1613 (0x64d), region = 72  ;;  %s3170_s22 = sshll.u32 (!%p3396_p8), %s3167_s13, 7 }
  0xc7   : > { %s507_s12 = scalar_lea.sflag (!%p3396_p8), [#allocation3], %s3167_s13  ;;  %s3174_s18 = scalar_lea.vmem (!%p3396_p8), [#allocation2], %s3170_s22 }
  0xcd   : > { %2765 = dma.done.wait (%p3107_p6), %s507_s12, 2048  }
  0xce   : > { %2767 = vsyncadd (%p3107_p6), %s507_s12, 4294965248  ;;  %p3397_p4 = scmp.eq.s32.totalorder %s2915_s19, 0 }
  0xd0   : > { %2769 = dma.done.wait (%p3397_p4), [#allocation6], 2048   ;;  %p3398_p10 = pmov %p3397_p4 }
  0xd1   : > { %p3399_p11 = pmov %p3397_p4 }
  0xd2   : > { %2771 = vsyncadd (%p3398_p10), [#allocation6], 4294965248 }
  0xd3   : > { %2773 = dma.done.wait (%p3399_p11), [#allocation9], 2048   ;;  %p3400_p3 = pmov %p3397_p4 }
  0xd5   : > { %2775 = vsyncadd (%p3400_p3), [#allocation9], 4294965248  ;;  %p3401_p5 = pmov %p3400_p3 }
  0xd6   : > { %p3402_p7 = pmov %p3400_p3 }
  0xd7   : > { %2777 = dma.done.wait (%p3401_p5), [#allocation12], 2048  }
  0xd8   : > { %2779 = vsyncadd (%p3402_p7), [#allocation12], 4294965248  ;;  %v2446_v0 = vld [vmem:[#allocation5] sm:$0xff]   ;;  %v2447_v1 = vld [vmem:[#allocation5 + $0x8] sm:$0xff]   ;;  %s3403_s17 = sld [smem:[#allocation24_spill]]  ;;  %s3218_s24 = scalar_lea.vmem [#allocation15], %s3170_s22 }
  0xd9   : > { %2136 = vmatprep.subr.bf16.mxu0 %v2446_v0  ;;  %v2448_v2 = vld [vmem:[#allocation5 + $0x10] sm:$0xff]   ;;  %v2449_v3 = vld [vmem:[#allocation5 + $0x18] sm:$0xff]   ;;  %v588_v4 = vld [vmem:[%s3174_s18] sm:$0xff]  ;;  %s3404_s12 = sld [smem:[#allocation25_spill]]  ;;  %s3405_s26 = sld [smem:[#allocation26_spill]] }
  0xda   : > { %2137 = vmatpush3.bf16.msra.mxu0 %v2446_v0  ;;  %v589_v5 = vld [vmem:[%s3174_s18 + $0x8] sm:$0xff]  ;;  %v2450_v7 = vld [vmem:[#allocation5 + $0x20] sm:$0xff]   ;;  %v2456_v11 = vld [vmem:[#allocation7 + $0x10] sm:$0xff]   ;;  %s3377_s27 = sshll.u32 %s2915_s19, 11  ;;  %s3406_s25 = sld [smem:[#allocation29_spill]] }
  0xdb   : > { %2138 = vmatprep.subr.bf16.mxu0 %v2447_v1  ;;  %v604_v6 = vpack.c.bf16 %v589_v5, %v588_v4  ;;  %v2454_v8 = vld [vmem:[#allocation7] sm:$0xff]   ;;  %v2455_v9 = vld [vmem:[#allocation7 + $0x8] sm:$0xff]   ;;  %v2452_v12 = vld [vmem:[#allocation5 + $0x30] sm:$0xff]   ;;  %s1791_s1 = sshll.u32 %s3218_s24, 4  ;;  %s1762_s14 = scalar_lea.sflag [#allocation16], %s3167_s13  ;;  %s3251_s1 = int_to_ptr.vmem [resolvable:$true] %s1791_s1 }
  0xdc   : > { %v2451_v10 = vld [vmem:[#allocation5 + $0x28] sm:$0xff]   ;;  %2168 = vmatprep.subr.bf16.mxu1 %v2454_v8  ;;  %v2457_v13 = vld [vmem:[#allocation7 + $0x18] sm:$0xff]   ;;  %v2458_v15 = vld [vmem:[#allocation7 + $0x20] sm:$0xff]   ;;  %p3407_p9 = scmp.ne.s32.totalorder %s3393_s6, 0 }
  0xdd   : > { %2152 = vmatprep.mubr.bf16.mxu0 %v604_v6  ;;  %2169 = vmatpush3.bf16.msra.mxu1 %v2454_v8  ;;  %v2453_v14 = vld [vmem:[#allocation5 + $0x38] sm:$0xff]   ;;  %v590_v16 = vld [vmem:[%s3174_s18 + $0x10] sm:$0xff]  ;;  %v592_v18 = vld [vmem:[%s3174_s18 + $0x20] sm:$0xff] }
  0xde   : > { %2139 = vmatpush3.bf16.msra.mxu0 %v2447_v1  ;;  %2170 = vmatprep.subr.bf16.mxu1 %v2455_v9  ;;  %v591_v17 = vld [vmem:[%s3174_s18 + $0x18] sm:$0xff]  ;;  %v593_v19 = vld [vmem:[%s3174_s18 + $0x28] sm:$0xff]  ;;  %v594_v23 = vld [vmem:[%s3174_s18 + $0x30] sm:$0xff] }
  0xdf   : > { %2140 = vmatprep.subr.bf16.mxu0 %v2448_v2  ;;  %v2459_v20 = vld [vmem:[#allocation7 + $0x28] sm:$0xff]   ;;  %v605_v21 = vpack.c.bf16 %v591_v17, %v590_v16  ;;  %v606_v22 = vpack.c.bf16 %v593_v19, %v592_v18  ;;  %v595_v24 = vld [vmem:[%s3174_s18 + $0x38] sm:$0xff]  ;;  %v596_v25 = vld [vmem:[%s3174_s18 + $0x40] sm:$0xff] }
  0xe0   : > { %v597_v26 = vld [vmem:[%s3174_s18 + $0x48] sm:$0xff]  ;;  %v607_v27 = vpack.c.bf16 %v595_v24, %v594_v23  ;;  %v598_v29 = vld [vmem:[%s3174_s18 + $0x50] sm:$0xff]  ;;  %v599_v30 = vld [vmem:[%s3174_s18 + $0x58] sm:$0xff] }
  0xe1   : > { %2171 = vmatpush3.bf16.msra.mxu1 %v2455_v9  ;;  %v608_v28 = vpack.c.bf16 %v597_v26, %v596_v25  ;;  %v600_v31 = vld [vmem:[%s3174_s18 + $0x60] sm:$0xff]  ;;  %v601_v32 = vld [vmem:[%s3174_s18 + $0x68] sm:$0xff]  ;;  %v609_v33 = vpack.c.bf16 %v599_v30, %v598_v29  ;;  %v602_v35 = vld [vmem:[%s3174_s18 + $0x70] sm:$0xff] }
  0xe2   : > { %2141 = vmatpush3.bf16.msra.mxu0 %v2448_v2  ;;  %2172 = vmatprep.subr.bf16.mxu1 %v2456_v11  ;;  %v610_v34 = vpack.c.bf16 %v601_v32, %v600_v31  ;;  %v603_v36 = vld [vmem:[%s3174_s18 + $0x78] sm:$0xff]  ;;  %v2460_v38 = vld [vmem:[#allocation7 + $0x30] sm:$0xff]   ;;  %v2462_v40 = vld [vmem:[#allocation8] sm:$0xff]   ;;  %s2815_s18 = smov [#allocation15]  }
  0xe3   : > { %2142 = vmatprep.subr.bf16.mxu0 %v2449_v3  ;;  %v611_v37 = vpack.c.bf16 %v603_v36, %v602_v35  ;;  %v2461_v39 = vld [vmem:[#allocation7 + $0x38] sm:$0xff]   ;;  %v2463_v41 = vld [vmem:[#allocation8 + $0x8] sm:$0xff]   ;;  %v2464_v42 = vld [vmem:[#allocation8 + $0x10] sm:$0xff]   ;;  %s2696_s20 = sshll.u32 %s2815_s18, 4  ;;  %s2697_s20 = int_to_ptr.vmem [resolvable:$false] %s2696_s20 }
  0xe4   : > { %v2465_v43 = vld [vmem:[#allocation8 + $0x18] sm:$0xff]   ;;  %v2466_v44 = vld [vmem:[#allocation8 + $0x20] sm:$0xff]   ;;  %v2467_v45 = vld [vmem:[#allocation8 + $0x28] sm:$0xff]   ;;  %p2699_p13 = scmp.lt.s32.totalorder %s3251_s1, %s2697_s20 }
  0xe5   : > { %2173 = vmatpush3.bf16.msra.mxu1 %v2456_v11  ;;  %v1975_v46 = vld [vmem:[%s3359_s2] ss:$0 sm:$0xff] }
  0xe6   : > { %2143 = vmatpush3.bf16.msra.mxu0 %v2449_v3  ;;  %2174 = vmatprep.subr.bf16.mxu1 %v2457_v13 }
  0xe7   : > { %2144 = vmatprep.subr.bf16.mxu0 %v2450_v7 }
  0xe9   : > { %2175 = vmatpush3.bf16.msra.mxu1 %v2457_v13 }
  0xea   : > { %2145 = vmatpush3.bf16.msra.mxu0 %v2450_v7  ;;  %2176 = vmatprep.subr.bf16.mxu1 %v2458_v15 }
  0xeb   : > { %2146 = vmatprep.subr.bf16.mxu0 %v2451_v10 }
  0xed   : > { %2177 = vmatpush3.bf16.msra.mxu1 %v2458_v15 }
  0xee   : > { %2147 = vmatpush3.bf16.msra.mxu0 %v2451_v10  ;;  %2178 = vmatprep.subr.bf16.mxu1 %v2459_v20 }
  0xef   : > { %2148 = vmatprep.subr.bf16.mxu0 %v2452_v12 }
  0xf1   : > { %2179 = vmatpush3.bf16.msra.mxu1 %v2459_v20 }
  0xf2   : > { %2149 = vmatpush3.bf16.msra.mxu0 %v2452_v12  ;;  %2180 = vmatprep.subr.bf16.mxu1 %v2460_v38 }
  0xf3   : > { %2150 = vmatprep.subr.bf16.mxu0 %v2453_v14 }
  0xf5   : > { %2181 = vmatpush3.bf16.msra.mxu1 %v2460_v38 }
  0xf6   : > { %2151 = vmatpush3.bf16.msra.mxu0 %v2453_v14  ;;  %2182 = vmatprep.subr.bf16.mxu1 %v2461_v39 }
  0xf7   : > { %2200 = vmatprep.subr.bf16.mxu0 %v2462_v40 }
  0xf9   : > { %2153 = vmatmul.mubr.bf16.vlgmr.msra.gmra.mrb[0].mxu0 %v605_v21  ;;  %2183 = vmatpush3.bf16.msra.mxu1 %v2461_v39  ;;  %v2468_v39 = vld [vmem:[#allocation8 + $0x30] sm:$0xff]  }
  0xfa   : > { %2156 = vmatprep.mubr.bf16.mxu0 %v606_v22  ;;  %2201 = vmatpush3.bf16.msra.mxu0 %v2462_v40  ;;  %v2469_v40 = vld [vmem:[#allocation8 + $0x38] sm:$0xff]  }
  0xfb   : > { %2202 = vmatprep.subr.bf16.mxu0 %v2463_v41 }
  0xfe   : > { %2203 = vmatpush3.bf16.msra.mxu0 %v2463_v41  ;;  %v2470_v41 = vld [vmem:[#allocation10] sm:$0xff]  }
  0xff   : > { %2204 = vmatprep.subr.bf16.mxu0 %v2464_v42  ;;  %2232 = vmatprep.subr.bf16.mxu1 %v2470_v41 }
 0x101   : > { %2157 = vmatmul.mubr.bf16.gmra.mrb[4].mxu0 %v607_v27 }
 0x102   : > { %2160 = vmatprep.mubr.bf16.mxu0 %v608_v28  ;;  %2205 = vmatpush3.bf16.msra.mxu0 %v2464_v42  ;;  %v2471_v42 = vld [vmem:[#allocation10 + $0x8] sm:$0xff]  }
 0x103   : > { %2206 = vmatprep.subr.bf16.mxu0 %v2465_v43 }
 0x106   : > { %2207 = vmatpush3.bf16.msra.mxu0 %v2465_v43  ;;  %v2472_v43 = vld [vmem:[#allocation10 + $0x10] sm:$0xff]  }
 0x107   : > { %2208 = vmatprep.subr.bf16.mxu0 %v2466_v44 }
 0x109   : > { %2161 = vmatmul.mubr.bf16.gmra.mrb[8].mxu0 %v609_v33 }
 0x10a   : > { %2164 = vmatprep.mubr.bf16.mxu0 %v610_v34  ;;  %2209 = vmatpush3.bf16.msra.mxu0 %v2466_v44  ;;  %v2473_v44 = vld [vmem:[#allocation10 + $0x18] sm:$0xff]  }
 0x10b   : > { %2210 = vmatprep.subr.bf16.mxu0 %v2467_v45 }
 0x10e   : > { %2211 = vmatpush3.bf16.msra.mxu0 %v2467_v45  ;;  %v2474_v45 = vld [vmem:[#allocation10 + $0x20] sm:$0xff]  }
 0x10f   : > { %2212 = vmatprep.subr.bf16.mxu0 %v2468_v39 }
 0x111   : > { %2165 = vmatmul.mubr.bf16.gmra.mrb[12].mxu0 %v611_v37 }
 0x112   : > { %2213 = vmatpush3.bf16.msra.mxu0 %v2468_v39 }
 0x113   : > { %2214 = vmatprep.subr.bf16.mxu0 %v2469_v40 }
 0x116   : > { %2215 = vmatpush3.bf16.msra.mxu0 %v2469_v40  ;;  %v2476_v40 = vld [vmem:[#allocation10 + $0x30] sm:$0xff]  }
 0x1cc   : > { %v2154_v47 = vpop.f32.mrb[0].mxu0 }
 0x1cd   : > { %v726_v48 = vadd.f32 %v2154_v47, %v1975_v46  ;;  %v717_v49 = vpop.f32.mrb[1].mxu0  ;;  %v1984_v47 = vld [vmem:[%s3361_s4] ss:$0 sm:$0xff] }
 0x1ce   : > { %v718_v50 = vadd.f32 %v1975_v46, %v717_v49  ;;  %v2155_v51 = vpop.f32.mrb[2].mxu0 }
 0x1cf   : > { %v729_v52 = vadd.f32 %v2155_v51, %v1975_v46  ;;  %v720_v53 = vpop.f32.mrb[3].mxu0  ;;  %v782_v55 = vmax.f32 %v726_v48, 0.0 }
 0x1d0   : > { %v721_v54 = vadd.f32 %v1975_v46, %v720_v53  ;;  %v780_v57 = vmax.f32 %v718_v50, 0.0 }
 0x1d1   : > { %v783_v56 = vmax.f32 %v729_v52, 0.0 }
 0x1d2   : > { %v781_v58 = vmax.f32 %v721_v54, 0.0 }
 0x1d3   : > { %v797_v59 = vpack.c.bf16 %v783_v56, %v782_v55 }
 0x1d4   : > { %v2158_v60 = vpop.f32.mrb[4].mxu0  ;;  %v796_v61 = vpack.c.bf16 %v781_v58, %v780_v57 }
 0x1d5   : > { %v742_v62 = vadd.f32 %v2158_v60, %v1975_v46  ;;  %v733_v63 = vpop.f32.mrb[5].mxu0 }
 0x1d6   : > { %v734_v0 = vadd.f32 %v1975_v46, %v733_v63  ;;  %v2159_v1 = vpop.f32.mrb[6].mxu0  ;;  %2184 = vmatprep.mubr.bf16.mxu1 %v796_v61 }
 0x1d7   : > { %v745_v2 = vadd.f32 %v2159_v1, %v1975_v46  ;;  %v736_v3 = vpop.f32.mrb[7].mxu0  ;;  %2185 = vmatmul.mubr.bf16.vlgmr.msra.gmra.mrb[0].mxu1 %v797_v59  ;;  %v786_v5 = vmax.f32 %v742_v62, 0.0 }
 0x1d8   : > { %v737_v4 = vadd.f32 %v1975_v46, %v736_v3  ;;  %v784_v7 = vmax.f32 %v734_v0, 0.0  ;;  %2233 = vmatpush3.bf16.msra.mxu1 %v2470_v41  ;;  %v2477_v41 = vld [vmem:[#allocation10 + $0x38] sm:$0xff]  }
 0x1d9   : > { %v787_v6 = vmax.f32 %v745_v2, 0.0  ;;  %2234 = vmatprep.subr.bf16.mxu1 %v2471_v42 }
 0x1da   : > { %v785_v8 = vmax.f32 %v737_v4, 0.0 }
 0x1db   : > { %v799_v9 = vpack.c.bf16 %v787_v6, %v786_v5 }
 0x1dc   : > { %v798_v10 = vpack.c.bf16 %v785_v8, %v784_v7  ;;  %v2162_v11 = vpop.f32.mrb[8].mxu0  ;;  %2235 = vmatpush3.bf16.msra.mxu1 %v2471_v42  ;;  %v2478_v42 = vld [vmem:[#allocation11] sm:$0xff]  }
 0x1dd   : > { %v758_v12 = vadd.f32 %v2162_v11, %v1975_v46  ;;  %v749_v13 = vpop.f32.mrb[9].mxu0  ;;  %2236 = vmatprep.subr.bf16.mxu1 %v2472_v43  ;;  %2264 = vmatprep.subr.bf16.mxu0 %v2478_v42 }
 0x1de   : > { %v750_v14 = vadd.f32 %v1975_v46, %v749_v13  ;;  %v2163_v15 = vpop.f32.mrb[10].mxu0  ;;  %2188 = vmatprep.mubr.bf16.mxu1 %v798_v10 }
 0x1df   : > { %v761_v16 = vadd.f32 %v2163_v15, %v1975_v46  ;;  %v752_v17 = vpop.f32.mrb[11].mxu0  ;;  %2189 = vmatmul.mubr.bf16.gmra.mrb[4].mxu1 %v799_v9  ;;  %v790_v19 = vmax.f32 %v758_v12, 0.0 }
 0x1e0   : > { %v753_v18 = vadd.f32 %v1975_v46, %v752_v17  ;;  %v788_v21 = vmax.f32 %v750_v14, 0.0  ;;  %2237 = vmatpush3.bf16.msra.mxu1 %v2472_v43  ;;  %v2479_v43 = vld [vmem:[#allocation11 + $0x8] sm:$0xff]  }
 0x1e1   : > { %v791_v20 = vmax.f32 %v761_v16, 0.0  ;;  %2238 = vmatprep.subr.bf16.mxu1 %v2473_v44 }
 0x1e2   : > { %v789_v22 = vmax.f32 %v753_v18, 0.0 }
 0x1e3   : > { %v801_v23 = vpack.c.bf16 %v791_v20, %v790_v19 }
 0x1e4   : > { %v800_v24 = vpack.c.bf16 %v789_v22, %v788_v21  ;;  %v2166_v25 = vpop.f32.mrb[12].mxu0  ;;  %2239 = vmatpush3.bf16.msra.mxu1 %v2473_v44  ;;  %v2480_v44 = vld [vmem:[#allocation11 + $0x10] sm:$0xff]  }
 0x1e5   : > { %v774_v26 = vadd.f32 %v2166_v25, %v1975_v46  ;;  %v765_v27 = vpop.f32.mrb[13].mxu0  ;;  %2240 = vmatprep.subr.bf16.mxu1 %v2474_v45 }
 0x1e6   : > { %v766_v28 = vadd.f32 %v1975_v46, %v765_v27  ;;  %v2167_v29 = vpop.f32.mrb[14].mxu0  ;;  %2192 = vmatprep.mubr.bf16.mxu1 %v800_v24 }
 0x1e7   : > { %v777_v30 = vadd.f32 %v2167_v29, %v1975_v46  ;;  %v768_v31 = vpop.f32.mrb[15].mxu0  ;;  %2193 = vmatmul.mubr.bf16.gmra.mrb[8].mxu1 %v801_v23  ;;  %v794_v33 = vmax.f32 %v774_v26, 0.0 }
 0x1e8   : > { %v769_v32 = vadd.f32 %v1975_v46, %v768_v31  ;;  %v792_v35 = vmax.f32 %v766_v28, 0.0  ;;  %v2475_v46 = vld [vmem:[#allocation10 + $0x28] sm:$0xff]   ;;  %2241 = vmatpush3.bf16.msra.mxu1 %v2474_v45  ;;  %v2481_v45 = vld [vmem:[#allocation11 + $0x18] sm:$0xff]  }
 0x1e9   : > { %v795_v34 = vmax.f32 %v777_v30, 0.0  ;;  %2242 = vmatprep.subr.bf16.mxu1 %v2475_v46 }
 0x1ea   : > { %v793_v36 = vmax.f32 %v769_v32, 0.0 }
 0x1eb   : > { %v803_v37 = vpack.c.bf16 %v795_v34, %v794_v33 }
 0x1ec   : > { %v802_v38 = vpack.c.bf16 %v793_v36, %v792_v35  ;;  %2243 = vmatpush3.bf16.msra.mxu1 %v2475_v46  ;;  %v2482_v46 = vld [vmem:[#allocation11 + $0x20] sm:$0xff]  }
 0x1ed   : > { %2244 = vmatprep.subr.bf16.mxu1 %v2476_v40 }
 0x1ee   : > { %2196 = vmatprep.mubr.bf16.mxu1 %v802_v38 }
 0x1ef   : > { %2197 = vmatmul.mubr.bf16.gmra.mrb[12].mxu1 %v803_v37 }
 0x1f0   : > { %2245 = vmatpush3.bf16.msra.mxu1 %v2476_v40 }
 0x1f1   : > { %2246 = vmatprep.subr.bf16.mxu1 %v2477_v41 }
 0x1f4   : > { %2247 = vmatpush3.bf16.msra.mxu1 %v2477_v41 }
 0x2aa   : > { %v2186_v48 = vpop.f32.mrb[0].mxu1 }
 0x2ab   : > { %v918_v49 = vadd.f32 %v2186_v48, %v1984_v47  ;;  %v909_v50 = vpop.f32.mrb[1].mxu1  ;;  %v1993_v48 = vld [vmem:[%s3403_s17] ss:$0 sm:$0xff]  ;;  %s3248_s17 = scalar_lea.hbm %s3406_s25, %s3377_s27 }
 0x2ac   : > { %v910_v51 = vadd.f32 %v1984_v47, %v909_v50  ;;  %v2187_v52 = vpop.f32.mrb[2].mxu1 }
 0x2ad   : > { %v921_v53 = vadd.f32 %v2187_v52, %v1984_v47  ;;  %v912_v54 = vpop.f32.mrb[3].mxu1  ;;  %v974_v56 = vmax.f32 %v918_v49, 0.0 }
 0x2ae   : > { %v913_v55 = vadd.f32 %v1984_v47, %v912_v54  ;;  %v972_v58 = vmax.f32 %v910_v51, 0.0 }
 0x2af   : > { %v975_v57 = vmax.f32 %v921_v53, 0.0 }
 0x2b0   : > { %v973_v59 = vmax.f32 %v913_v55, 0.0 }
 0x2b1   : > { %v989_v60 = vpack.c.bf16 %v975_v57, %v974_v56 }
 0x2b2   : > { %v988_v61 = vpack.c.bf16 %v973_v59, %v972_v58  ;;  %v2190_v62 = vpop.f32.mrb[4].mxu1 }
 0x2b3   : > { %v934_v63 = vadd.f32 %v2190_v62, %v1984_v47  ;;  %v925_v0 = vpop.f32.mrb[5].mxu1 }
 0x2b4   : > { %v926_v1 = vadd.f32 %v1984_v47, %v925_v0  ;;  %v2191_v2 = vpop.f32.mrb[6].mxu1  ;;  %2216 = vmatprep.mubr.bf16.mxu0 %v988_v61 }
 0x2b5   : > { %v937_v3 = vadd.f32 %v2191_v2, %v1984_v47  ;;  %v928_v4 = vpop.f32.mrb[7].mxu1  ;;  %2217 = vmatmul.mubr.bf16.vlgmr.msra.gmra.mrb[16].mxu0 %v989_v60  ;;  %v978_v6 = vmax.f32 %v934_v63, 0.0 }
 0x2b6   : > { %v929_v5 = vadd.f32 %v1984_v47, %v928_v4  ;;  %v976_v8 = vmax.f32 %v926_v1, 0.0  ;;  %2265 = vmatpush3.bf16.msra.mxu0 %v2478_v42 }
 0x2b7   : > { %v979_v7 = vmax.f32 %v937_v3, 0.0  ;;  %2266 = vmatprep.subr.bf16.mxu0 %v2479_v43 }
 0x2b8   : > { %v977_v9 = vmax.f32 %v929_v5, 0.0 }
 0x2b9   : > { %v991_v10 = vpack.c.bf16 %v979_v7, %v978_v6 }
 0x2ba   : > { %v990_v11 = vpack.c.bf16 %v977_v9, %v976_v8  ;;  %v2194_v12 = vpop.f32.mrb[8].mxu1  ;;  %2267 = vmatpush3.bf16.msra.mxu0 %v2479_v43 }
 0x2bb   : > { %v950_v13 = vadd.f32 %v2194_v12, %v1984_v47  ;;  %v941_v14 = vpop.f32.mrb[9].mxu1  ;;  %2268 = vmatprep.subr.bf16.mxu0 %v2480_v44 }
 0x2bc   : > { %v942_v15 = vadd.f32 %v1984_v47, %v941_v14  ;;  %v2195_v16 = vpop.f32.mrb[10].mxu1  ;;  %2220 = vmatprep.mubr.bf16.mxu0 %v990_v11 }
 0x2bd   : > { %v953_v17 = vadd.f32 %v2195_v16, %v1984_v47  ;;  %v944_v18 = vpop.f32.mrb[11].mxu1  ;;  %2221 = vmatmul.mubr.bf16.gmra.mrb[20].mxu0 %v991_v10  ;;  %v982_v20 = vmax.f32 %v950_v13, 0.0 }
 0x2be   : > { %v945_v19 = vadd.f32 %v1984_v47, %v944_v18  ;;  %v980_v22 = vmax.f32 %v942_v15, 0.0  ;;  %2269 = vmatpush3.bf16.msra.mxu0 %v2480_v44 }
 0x2bf   : > { %v983_v21 = vmax.f32 %v953_v17, 0.0  ;;  %2270 = vmatprep.subr.bf16.mxu0 %v2481_v45 }
 0x2c0   : > { %v981_v23 = vmax.f32 %v945_v19, 0.0 }
 0x2c1   : > { %v993_v24 = vpack.c.bf16 %v983_v21, %v982_v20 }
 0x2c2   : > { %v992_v25 = vpack.c.bf16 %v981_v23, %v980_v22  ;;  %v2198_v26 = vpop.f32.mrb[12].mxu1  ;;  %2271 = vmatpush3.bf16.msra.mxu0 %v2481_v45 }
 0x2c3   : > { %v966_v27 = vadd.f32 %v2198_v26, %v1984_v47  ;;  %v957_v28 = vpop.f32.mrb[13].mxu1  ;;  %2272 = vmatprep.subr.bf16.mxu0 %v2482_v46  ;;  %v2485_v26 = vld [vmem:[#allocation11 + $0x38] sm:$0xff]  }
 0x2c4   : > { %v958_v29 = vadd.f32 %v1984_v47, %v957_v28  ;;  %v2199_v30 = vpop.f32.mrb[14].mxu1  ;;  %2224 = vmatprep.mubr.bf16.mxu0 %v992_v25  ;;  %v2484_v25 = vld [vmem:[#allocation11 + $0x30] sm:$0xff]   ;;  %v2487_v28 = vld [vmem:[#allocation13 + $0x8] sm:$0xff]  }
 0x2c5   : > { %v969_v31 = vadd.f32 %v2199_v30, %v1984_v47  ;;  %v960_v32 = vpop.f32.mrb[15].mxu1  ;;  %2225 = vmatmul.mubr.bf16.gmra.mrb[24].mxu0 %v993_v24  ;;  %v986_v34 = vmax.f32 %v966_v27, 0.0  ;;  %v2486_v27 = vld [vmem:[#allocation13] sm:$0xff]   ;;  %v2489_v30 = vld [vmem:[#allocation13 + $0x18] sm:$0xff]  }
 0x2c6   : > { %v961_v33 = vadd.f32 %v1984_v47, %v960_v32  ;;  %v984_v36 = vmax.f32 %v958_v29, 0.0  ;;  %v2483_v47 = vld [vmem:[#allocation11 + $0x28] sm:$0xff]   ;;  %2273 = vmatpush3.bf16.msra.mxu0 %v2482_v46  ;;  %2296 = vmatprep.subr.bf16.mxu1 %v2486_v27  ;;  %v2488_v29 = vld [vmem:[#allocation13 + $0x10] sm:$0xff]  }
 0x2c7   : > { %v987_v35 = vmax.f32 %v969_v31, 0.0  ;;  %2274 = vmatprep.subr.bf16.mxu0 %v2483_v47  ;;  %v2490_v31 = vld [vmem:[#allocation13 + $0x20] sm:$0xff]   ;;  %v2491_v32 = vld [vmem:[#allocation13 + $0x28] sm:$0xff]  }
 0x2c8   : > { %v985_v37 = vmax.f32 %v961_v33, 0.0  ;;  %v2002_v33 = vld [vmem:[%s3404_s12] ss:$0 sm:$0xff]  ;;  %s2692_s12 = scalar_lea.vmem %s3251_s1, 2048 }
 0x2c9   : > { %v995_v38 = vpack.c.bf16 %v987_v35, %v986_v34  ;;  %p2693_p6 = scmp.ne.s32.totalorder %s3251_s1, %s2692_s12 }
 0x2ca   : > { %v994_v39 = vpack.c.bf16 %v985_v37, %v984_v36  ;;  %2275 = vmatpush3.bf16.msra.mxu0 %v2483_v47 }
 0x2cb   : > { %2276 = vmatprep.subr.bf16.mxu0 %v2484_v25  ;;  %p2694_p12 = pnand %p2693_p6, %p3407_p9 }
 0x2cc   : > { %2228 = vmatprep.mubr.bf16.mxu0 %v994_v39 }
 0x2cd   : > { %2229 = vmatmul.mubr.bf16.gmra.mrb[28].mxu0 %v995_v38  ;;  %p2695_p1 = pneg %p2694_p12 }
 0x2ce   : > { %2277 = vmatpush3.bf16.msra.mxu0 %v2484_v25 }
 0x2cf   : > { %2278 = vmatprep.subr.bf16.mxu0 %v2485_v26 }
 0x2d2   : > { %2279 = vmatpush3.bf16.msra.mxu0 %v2485_v26  ;;  %v2492_v26 = vld [vmem:[#allocation13 + $0x30] sm:$0xff]  }
 0x388   : > { %v2218_v49 = vpop.f32.mrb[16].mxu0 }
 0x389   : > { %v1110_v50 = vadd.f32 %v2218_v49, %v1993_v48  ;;  %v1101_v51 = vpop.f32.mrb[17].mxu0 }
 0x38a   : > { %v1102_v52 = vadd.f32 %v1993_v48, %v1101_v51  ;;  %v2219_v53 = vpop.f32.mrb[18].mxu0 }
 0x38b   : > { %1742 = vst [vmem:[%s3218_s24 + $0x10] sm:$0xff] %v1110_v50  ;;  %v1113_v54 = vadd.f32 %v2219_v53, %v1993_v48  ;;  %v1104_v55 = vpop.f32.mrb[19].mxu0 }
 0x38c   : > { %1740 = vst [vmem:[%s3218_s24] sm:$0xff] %v1102_v52  ;;  %v1105_v56 = vadd.f32 %v1993_v48, %v1104_v55 }
 0x38d   : > { %v1165_v57 = vpack.c.bf16 %v1113_v54, %v1110_v50  ;;  %1743 = vst [vmem:[%s3218_s24 + $0x18] sm:$0xff] %v1113_v54 }
 0x38e   : > { %v1164_v58 = vpack.c.bf16 %v1105_v56, %v1102_v52  ;;  %1741 = vst [vmem:[%s3218_s24 + $0x8] sm:$0xff] %v1105_v56 }
 0x390   : > { %v2222_v59 = vpop.f32.mrb[20].mxu0  ;;  %2248 = vmatprep.mubr.bf16.mxu1 %v1164_v58 }
 0x391   : > { %v1126_v60 = vadd.f32 %v2222_v59, %v1993_v48  ;;  %v1117_v61 = vpop.f32.mrb[21].mxu0  ;;  %2249 = vmatmul.mubr.bf16.vlgmr.msra.gmra.mrb[16].mxu1 %v1165_v57 }
 0x392   : > { %v1118_v62 = vadd.f32 %v1993_v48, %v1117_v61  ;;  %v2223_v63 = vpop.f32.mrb[22].mxu0  ;;  %2297 = vmatpush3.bf16.msra.mxu1 %v2486_v27  ;;  %v2493_v27 = vld [vmem:[#allocation13 + $0x38] sm:$0xff]  }
 0x393   : > { %1746 = vst [vmem:[%s3218_s24 + $0x30] sm:$0xff] %v1126_v60  ;;  %v1129_v0 = vadd.f32 %v2223_v63, %v1993_v48  ;;  %v1120_v1 = vpop.f32.mrb[23].mxu0  ;;  %2298 = vmatprep.subr.bf16.mxu1 %v2487_v28 }
 0x394   : > { %1744 = vst [vmem:[%s3218_s24 + $0x20] sm:$0xff] %v1118_v62  ;;  %v1121_v2 = vadd.f32 %v1993_v48, %v1120_v1 }
 0x395   : > { %v1167_v3 = vpack.c.bf16 %v1129_v0, %v1126_v60  ;;  %1747 = vst [vmem:[%s3218_s24 + $0x38] sm:$0xff] %v1129_v0 }
 0x396   : > { %v1166_v4 = vpack.c.bf16 %v1121_v2, %v1118_v62  ;;  %1745 = vst [vmem:[%s3218_s24 + $0x28] sm:$0xff] %v1121_v2  ;;  %2299 = vmatpush3.bf16.msra.mxu1 %v2487_v28  ;;  %v2011_v28 = vld [vmem:[%s3405_s26] ss:$0 sm:$0xff]  ;;  %s2698_s26 = scalar_lea.vmem %s2697_s20, 4096 }
 0x397   : > { %2300 = vmatprep.subr.bf16.mxu1 %v2488_v29  ;;  %p2700_p0 = scmp.lt.s32.totalorder %s2698_s26, %s2692_s12 }
 0x398   : > { %v2226_v5 = vpop.f32.mrb[24].mxu0  ;;  %2252 = vmatprep.mubr.bf16.mxu1 %v1166_v4 }
 0x399   : > { %v1142_v6 = vadd.f32 %v2226_v5, %v1993_v48  ;;  %v1133_v7 = vpop.f32.mrb[25].mxu0  ;;  %2253 = vmatmul.mubr.bf16.gmra.mrb[20].mxu1 %v1167_v3  ;;  %p2701_p2 = por %p2700_p0, %p2699_p13 }
 0x39a   : > { %v1134_v8 = vadd.f32 %v1993_v48, %v1133_v7  ;;  %v2227_v9 = vpop.f32.mrb[26].mxu0  ;;  %2301 = vmatpush3.bf16.msra.mxu1 %v2488_v29 }
 0x39b   : > { %1750 = vst [vmem:[%s3218_s24 + $0x50] sm:$0xff] %v1142_v6  ;;  %v1145_v10 = vadd.f32 %v2227_v9, %v1993_v48  ;;  %v1136_v11 = vpop.f32.mrb[27].mxu0  ;;  %2302 = vmatprep.subr.bf16.mxu1 %v2489_v30  ;;  %p2702_p8 = pnand %p2701_p2, %p2695_p1 }
 0x39c   : > { %1748 = vst [vmem:[%s3218_s24 + $0x40] sm:$0xff] %v1134_v8  ;;  %v1137_v12 = vadd.f32 %v1993_v48, %v1136_v11 }
 0x39d   : > { %v1169_v13 = vpack.c.bf16 %v1145_v10, %v1142_v6  ;;  %1751 = vst [vmem:[%s3218_s24 + $0x58] sm:$0xff] %v1145_v10 }
 0x39e   : > { %v1168_v14 = vpack.c.bf16 %v1137_v12, %v1134_v8  ;;  %1749 = vst [vmem:[%s3218_s24 + $0x48] sm:$0xff] %v1137_v12  ;;  %2303 = vmatpush3.bf16.msra.mxu1 %v2489_v30 }
 0x39f   : > { %2304 = vmatprep.subr.bf16.mxu1 %v2490_v31 }
 0x3a0   : > { %v2230_v15 = vpop.f32.mrb[28].mxu0  ;;  %2256 = vmatprep.mubr.bf16.mxu1 %v1168_v14 }
 0x3a1   : > { %v1158_v16 = vadd.f32 %v2230_v15, %v1993_v48  ;;  %v1149_v17 = vpop.f32.mrb[29].mxu0  ;;  %2257 = vmatmul.mubr.bf16.gmra.mrb[24].mxu1 %v1169_v13 }
 0x3a2   : > { %v1150_v18 = vadd.f32 %v1993_v48, %v1149_v17  ;;  %v2231_v19 = vpop.f32.mrb[30].mxu0  ;;  %2305 = vmatpush3.bf16.msra.mxu1 %v2490_v31 }
 0x3a3   : > { %1754 = vst [vmem:[%s3218_s24 + $0x70] sm:$0xff] %v1158_v16  ;;  %v1161_v20 = vadd.f32 %v2231_v19, %v1993_v48  ;;  %v1152_v21 = vpop.f32.mrb[31].mxu0  ;;  %2306 = vmatprep.subr.bf16.mxu1 %v2491_v32 }
 0x3a4   : > { %1752 = vst [vmem:[%s3218_s24 + $0x60] sm:$0xff] %v1150_v18  ;;  %v1153_v22 = vadd.f32 %v1993_v48, %v1152_v21 }
 0x3a5   : > { %v1171_v23 = vpack.c.bf16 %v1161_v20, %v1158_v16  ;;  %1755 = vst [vmem:[%s3218_s24 + $0x78] sm:$0xff] %v1161_v20 }
 0x3a6   : > { %v1170_v24 = vpack.c.bf16 %v1153_v22, %v1150_v18  ;;  %1753 = vst [vmem:[%s3218_s24 + $0x68] sm:$0xff] %v1153_v22  ;;  %2307 = vmatpush3.bf16.msra.mxu1 %v2491_v32 }
 0x3a7   : > { %2308 = vmatprep.subr.bf16.mxu1 %v2492_v26 }
 0x3a8   : > { %2260 = vmatprep.mubr.bf16.mxu1 %v1170_v24 }
 0x3a9   : > { %2261 = vmatmul.mubr.bf16.gmra.mrb[28].mxu1 %v1171_v23 }
 0x3aa   : > { %2309 = vmatpush3.bf16.msra.mxu1 %v2492_v26 }
 0x3ab   : > { %2310 = vmatprep.subr.bf16.mxu1 %v2493_v27 }
 0x3ae   : > { %2311 = vmatpush3.bf16.msra.mxu1 %v2493_v27 }
 0x464   : > { %v2250_v34 = vpop.f32.mrb[16].mxu1 }
 0x465   : > { %v1286_v35 = vadd.f32 %v2250_v34, %v2002_v33  ;;  %v1277_v36 = vpop.f32.mrb[17].mxu1 }
 0x466   : > { %v1278_v37 = vadd.f32 %v2002_v33, %v1277_v36  ;;  %v2251_v38 = vpop.f32.mrb[18].mxu1 }
 0x467   : > { %v1289_v39 = vadd.f32 %v2251_v38, %v2002_v33  ;;  %v1280_v40 = vpop.f32.mrb[19].mxu1  ;;  %v1342_v42 = vmax.f32 %v1286_v35, 0.0 }
 0x468   : > { %v1281_v41 = vadd.f32 %v2002_v33, %v1280_v40  ;;  %v1340_v44 = vmax.f32 %v1278_v37, 0.0 }
 0x469   : > { %v1343_v43 = vmax.f32 %v1289_v39, 0.0 }
 0x46a   : > { %v1341_v45 = vmax.f32 %v1281_v41, 0.0 }
 0x46b   : > { %v1357_v46 = vpack.c.bf16 %v1343_v43, %v1342_v42 }
 0x46c   : > { %v1356_v47 = vpack.c.bf16 %v1341_v45, %v1340_v44  ;;  %v2254_v48 = vpop.f32.mrb[20].mxu1 }
 0x46d   : > { %v1302_v49 = vadd.f32 %v2254_v48, %v2002_v33  ;;  %v1293_v50 = vpop.f32.mrb[21].mxu1 }
 0x46e   : > { %v1294_v51 = vadd.f32 %v2002_v33, %v1293_v50  ;;  %v2255_v52 = vpop.f32.mrb[22].mxu1  ;;  %2280 = vmatprep.mubr.bf16.mxu0 %v1356_v47 }
 0x46f   : > { %v1305_v53 = vadd.f32 %v2255_v52, %v2002_v33  ;;  %v1296_v54 = vpop.f32.mrb[23].mxu1  ;;  %2281 = vmatmul.mubr.bf16.vlgmr.msra.gmra.mrb[32].mxu0 %v1357_v46  ;;  %v1346_v56 = vmax.f32 %v1302_v49, 0.0 }
 0x470   : > { %v1297_v55 = vadd.f32 %v2002_v33, %v1296_v54  ;;  %v1344_v58 = vmax.f32 %v1294_v51, 0.0 }
 0x471   : > { %v1347_v57 = vmax.f32 %v1305_v53, 0.0 }
 0x472   : > { %v1345_v59 = vmax.f32 %v1297_v55, 0.0 }
 0x473   : > { %v1359_v60 = vpack.c.bf16 %v1347_v57, %v1346_v56 }
 0x474   : > { %v1358_v61 = vpack.c.bf16 %v1345_v59, %v1344_v58  ;;  %v2258_v62 = vpop.f32.mrb[24].mxu1 }
 0x475   : > { %v1318_v63 = vadd.f32 %v2258_v62, %v2002_v33  ;;  %v1309_v0 = vpop.f32.mrb[25].mxu1 }
 0x476   : > { %v1310_v1 = vadd.f32 %v2002_v33, %v1309_v0  ;;  %v2259_v2 = vpop.f32.mrb[26].mxu1  ;;  %2284 = vmatprep.mubr.bf16.mxu0 %v1358_v61 }
 0x477   : > { %v1321_v3 = vadd.f32 %v2259_v2, %v2002_v33  ;;  %v1312_v4 = vpop.f32.mrb[27].mxu1  ;;  %2285 = vmatmul.mubr.bf16.gmra.mrb[36].mxu0 %v1359_v60  ;;  %v1350_v6 = vmax.f32 %v1318_v63, 0.0 }
 0x478   : > { %v1313_v5 = vadd.f32 %v2002_v33, %v1312_v4  ;;  %v1348_v8 = vmax.f32 %v1310_v1, 0.0 }
 0x479   : > { %v1351_v7 = vmax.f32 %v1321_v3, 0.0 }
 0x47a   : > { %v1349_v9 = vmax.f32 %v1313_v5, 0.0 }
 0x47b   : > { %v1361_v10 = vpack.c.bf16 %v1351_v7, %v1350_v6 }
 0x47c   : > { %v1360_v11 = vpack.c.bf16 %v1349_v9, %v1348_v8  ;;  %v2262_v12 = vpop.f32.mrb[28].mxu1 }
 0x47d   : > { %v1334_v13 = vadd.f32 %v2262_v12, %v2002_v33  ;;  %v1325_v14 = vpop.f32.mrb[29].mxu1 }
 0x47e   : > { %v1326_v15 = vadd.f32 %v2002_v33, %v1325_v14  ;;  %v2263_v16 = vpop.f32.mrb[30].mxu1  ;;  %2288 = vmatprep.mubr.bf16.mxu0 %v1360_v11 }
 0x47f   : > { %v1337_v17 = vadd.f32 %v2263_v16, %v2002_v33  ;;  %v1328_v18 = vpop.f32.mrb[31].mxu1  ;;  %2289 = vmatmul.mubr.bf16.gmra.mrb[40].mxu0 %v1361_v10  ;;  %v1354_v20 = vmax.f32 %v1334_v13, 0.0 }
 0x480   : > { %v1329_v19 = vadd.f32 %v2002_v33, %v1328_v18  ;;  %v1352_v22 = vmax.f32 %v1326_v15, 0.0 }
 0x481   : > { %v1355_v21 = vmax.f32 %v1337_v17, 0.0 }
 0x482   : > { %v1353_v23 = vmax.f32 %v1329_v19, 0.0 }
 0x483   : > { %v1363_v24 = vpack.c.bf16 %v1355_v21, %v1354_v20 }
 0x484   : > { %v1362_v25 = vpack.c.bf16 %v1353_v23, %v1352_v22 }
 0x486   : > { %2292 = vmatprep.mubr.bf16.mxu0 %v1362_v25 }
 0x487   : > { %2293 = vmatmul.mubr.bf16.gmra.mrb[44].mxu0 %v1363_v24 }
 0x542   : > { %v2282_v29 = vpop.f32.mrb[32].mxu0 }
 0x543   : > { %v1478_v30 = vadd.f32 %v2282_v29, %v2011_v28  ;;  %v1469_v31 = vpop.f32.mrb[33].mxu0 }
 0x544   : > { %v1470_v32 = vadd.f32 %v2011_v28, %v1469_v31  ;;  %v2283_v33 = vpop.f32.mrb[34].mxu0 }
 0x545   : > { %v1481_v34 = vadd.f32 %v2283_v33, %v2011_v28  ;;  %v1472_v35 = vpop.f32.mrb[35].mxu0  ;;  %v1534_v37 = vmax.f32 %v1478_v30, 0.0 }
 0x546   : > { %v1473_v36 = vadd.f32 %v2011_v28, %v1472_v35  ;;  %v1532_v39 = vmax.f32 %v1470_v32, 0.0 }
 0x547   : > { %v1535_v38 = vmax.f32 %v1481_v34, 0.0 }
 0x548   : > { %v1533_v40 = vmax.f32 %v1473_v36, 0.0 }
 0x549   : > { %v1549_v41 = vpack.c.bf16 %v1535_v38, %v1534_v37 }
 0x54a   : > { %v1548_v42 = vpack.c.bf16 %v1533_v40, %v1532_v39  ;;  %v2286_v43 = vpop.f32.mrb[36].mxu0 }
 0x54b   : > { %v1494_v44 = vadd.f32 %v2286_v43, %v2011_v28  ;;  %v1485_v45 = vpop.f32.mrb[37].mxu0 }
 0x54c   : > { %v1486_v46 = vadd.f32 %v2011_v28, %v1485_v45  ;;  %v2287_v47 = vpop.f32.mrb[38].mxu0  ;;  %2312 = vmatprep.mubr.bf16.mxu1 %v1548_v42 }
 0x54d   : > { %v1497_v48 = vadd.f32 %v2287_v47, %v2011_v28  ;;  %v1488_v49 = vpop.f32.mrb[39].mxu0  ;;  %2313 = vmatmul.mubr.bf16.vlgmr.msra.gmra.mrb[32].mxu1 %v1549_v41  ;;  %v1538_v51 = vmax.f32 %v1494_v44, 0.0 }
 0x54e   : > { %v1489_v50 = vadd.f32 %v2011_v28, %v1488_v49  ;;  %v1536_v53 = vmax.f32 %v1486_v46, 0.0 }
 0x54f   : > { %v1539_v52 = vmax.f32 %v1497_v48, 0.0 }
 0x550   : > { %v1537_v54 = vmax.f32 %v1489_v50, 0.0 }
 0x551   : > { %v1551_v55 = vpack.c.bf16 %v1539_v52, %v1538_v51 }
 0x552   : > { %v1550_v56 = vpack.c.bf16 %v1537_v54, %v1536_v53  ;;  %v2290_v57 = vpop.f32.mrb[40].mxu0 }
 0x553   : > { %v1510_v58 = vadd.f32 %v2290_v57, %v2011_v28  ;;  %v1501_v59 = vpop.f32.mrb[41].mxu0 }
 0x554   : > { %v1502_v60 = vadd.f32 %v2011_v28, %v1501_v59  ;;  %v2291_v61 = vpop.f32.mrb[42].mxu0  ;;  %2316 = vmatprep.mubr.bf16.mxu1 %v1550_v56 }
 0x555   : > { %v1513_v62 = vadd.f32 %v2291_v61, %v2011_v28  ;;  %v1504_v63 = vpop.f32.mrb[43].mxu0  ;;  %2317 = vmatmul.mubr.bf16.gmra.mrb[36].mxu1 %v1551_v55  ;;  %v1542_v1 = vmax.f32 %v1510_v58, 0.0 }
 0x556   : > { %v1505_v0 = vadd.f32 %v2011_v28, %v1504_v63  ;;  %v1540_v3 = vmax.f32 %v1502_v60, 0.0 }
 0x557   : > { %v1543_v2 = vmax.f32 %v1513_v62, 0.0 }
 0x558   : > { %v1541_v4 = vmax.f32 %v1505_v0, 0.0 }
 0x559   : > { %v1553_v5 = vpack.c.bf16 %v1543_v2, %v1542_v1 }
 0x55a   : > { %v1552_v6 = vpack.c.bf16 %v1541_v4, %v1540_v3  ;;  %v2294_v7 = vpop.f32.mrb[44].mxu0 }
 0x55b   : > { %v1526_v8 = vadd.f32 %v2294_v7, %v2011_v28  ;;  %v1517_v9 = vpop.f32.mrb[45].mxu0 }
 0x55c   : > { %v1518_v10 = vadd.f32 %v2011_v28, %v1517_v9  ;;  %v2295_v11 = vpop.f32.mrb[46].mxu0  ;;  %2320 = vmatprep.mubr.bf16.mxu1 %v1552_v6 }
 0x55d   : > { %v1529_v12 = vadd.f32 %v2295_v11, %v2011_v28  ;;  %v1520_v13 = vpop.f32.mrb[47].mxu0  ;;  %2321 = vmatmul.mubr.bf16.gmra.mrb[40].mxu1 %v1553_v5  ;;  %v1546_v15 = vmax.f32 %v1526_v8, 0.0 }
 0x55e   : > { %v1521_v14 = vadd.f32 %v2011_v28, %v1520_v13  ;;  %v1544_v17 = vmax.f32 %v1518_v10, 0.0 }
 0x55f   : > { %v1547_v16 = vmax.f32 %v1529_v12, 0.0 }
 0x560   : > { %v1545_v18 = vmax.f32 %v1521_v14, 0.0 }
 0x561   : > { %v1555_v19 = vpack.c.bf16 %v1547_v16, %v1546_v15 }
 0x562   : > { %v1554_v20 = vpack.c.bf16 %v1545_v18, %v1544_v17 }
 0x564   : > { %2324 = vmatprep.mubr.bf16.mxu1 %v1554_v20 }
 0x565   : > { %2325 = vmatmul.mubr.bf16.gmra.mrb[44].mxu1 %v1555_v19 }
 0x566   : > { %2705 = shalt.err (!%p2702_p8)
}
 0x567   : > { %s2706_s24 = scalar_lea.hbm %s3248_s17, 2048  ;;  %s2710_s18 = scalar_lea.hbm %s3406_s25, 4096 }
 0x568   : > { %p2707_p4 = scmp.ne.s32.totalorder %s3248_s17, %s2706_s24  ;;  %p2711_p3 = scmp.lt.u32.totalorder %s3248_s17, %s3406_s25 }
 0x569   : > { %p2712_p5 = scmp.lt.u32.totalorder %s2710_s18, %s2706_s24  ;;  %p2714_p6 = scmp.lt.u32.totalorder %s2706_s24, %s3248_s17 }
 0x56a   : > { %p2708_p10 = pnand %p2707_p4, %p3407_p9 }
 0x56b   : > { %p2713_p7 = por %p2712_p5, %p2711_p3 }
 0x56c   : > { %p2709_p11 = pneg %p2708_p10 }
 0x56d   : > { %p2715_p12 = por %p2714_p6, %p2713_p7 }
 0x56f   : > { %p2716_p1 = pnand %p2715_p12, %p2709_p11 }
 0x571   : > { %2719 = shalt.err (!%p2716_p1)
}
 0x572   : > { %s3378_s12 = smov 128   ;;  %s2817_s26 = smov 8  }
 0x573   : > { %2355 = dma.vmem_to_hbm [thread:$0]  (%p3407_p9), %s3251_s1, 2048, %s3248_s17, %s1762_s14, %s3378_s12, %s3378_s12, %s2817_s26  }
 0x574   : > { %s3408_s23 = sld [smem:[#allocation27_spill]]  ;;  %s3284_s24 = scalar_lea.vmem [#allocation14], %s3170_s22 }
 0x575   : > { %s1775_s22 = sshll.u32 %s3284_s24, 4  ;;  %s3409_s17 = sshll.u32 %s2915_s19, 11  ;;  %s3308_s22 = int_to_ptr.vmem [resolvable:$true] %s1775_s22 }
 0x576   : > { %s3410_s18 = sld [smem:[#allocation28_spill]]  ;;  %s1757_s27 = scalar_lea.sflag [#allocation4], %s3167_s13 }
 0x577   : > { %s2720_s10 = scalar_lea.vmem %s3308_s22, 2048 }
 0x578   : > { %p2721_p13 = scmp.ne.s32.totalorder %s3308_s22, %s2720_s10 }
 0x57a   : > { %v2020_v21 = vld [vmem:[%s3408_s23] ss:$0 sm:$0xff]  ;;  %p2722_p0 = pnand %p2721_p13, %p3407_p9  ;;  %s2818_s23 = smov [#allocation14]  }
 0x57b   : > { %s2724_s19 = sshll.u32 %s2818_s23, 4  ;;  %s2725_s19 = int_to_ptr.vmem [resolvable:$false] %s2724_s19 }
 0x57c   : > { %s3306_s20 = scalar_lea.hbm %s3410_s18, %s3409_s17  ;;  %p2723_p2 = pneg %p2722_p0 }
 0x57d   : > { %s2726_s12 = scalar_lea.vmem %s2725_s19, 4096  ;;  %p2727_p8 = scmp.lt.s32.totalorder %s3308_s22, %s2725_s19 }
 0x57e   : > { %p2728_p4 = scmp.lt.s32.totalorder %s2726_s12, %s2720_s10 }
 0x580   : > { %p2729_p10 = por %p2728_p4, %p2727_p8 }
 0x582   : > { %p2730_p11 = pnand %p2729_p10, %p2723_p2 }
 0x620   : > { %v2314_v22 = vpop.f32.mrb[32].mxu1 }
 0x621   : > { %v1670_v23 = vadd.f32 %v2314_v22, %v2020_v21  ;;  %v1661_v24 = vpop.f32.mrb[33].mxu1 }
 0x622   : > { %v1662_v25 = vadd.f32 %v2020_v21, %v1661_v24  ;;  %v2315_v26 = vpop.f32.mrb[34].mxu1 }
 0x623   : > { %1726 = vst [vmem:[%s3284_s24 + $0x10] sm:$0xff] %v1670_v23  ;;  %v1673_v27 = vadd.f32 %v2315_v26, %v2020_v21  ;;  %v1664_v28 = vpop.f32.mrb[35].mxu1 }
 0x624   : > { %1724 = vst [vmem:[%s3284_s24] sm:$0xff] %v1662_v25  ;;  %v1665_v29 = vadd.f32 %v2020_v21, %v1664_v28 }
 0x625   : > { %1727 = vst [vmem:[%s3284_s24 + $0x18] sm:$0xff] %v1673_v27 }
 0x626   : > { %1725 = vst [vmem:[%s3284_s24 + $0x8] sm:$0xff] %v1665_v29 }
 0x628   : > { %v2318_v30 = vpop.f32.mrb[36].mxu1 }
 0x629   : > { %v1686_v31 = vadd.f32 %v2318_v30, %v2020_v21  ;;  %v1677_v32 = vpop.f32.mrb[37].mxu1 }
 0x62a   : > { %v1678_v33 = vadd.f32 %v2020_v21, %v1677_v32  ;;  %v2319_v34 = vpop.f32.mrb[38].mxu1 }
 0x62b   : > { %1730 = vst [vmem:[%s3284_s24 + $0x30] sm:$0xff] %v1686_v31  ;;  %v1689_v35 = vadd.f32 %v2319_v34, %v2020_v21  ;;  %v1680_v36 = vpop.f32.mrb[39].mxu1 }
 0x62c   : > { %1728 = vst [vmem:[%s3284_s24 + $0x20] sm:$0xff] %v1678_v33  ;;  %v1681_v37 = vadd.f32 %v2020_v21, %v1680_v36 }
 0x62d   : > { %1731 = vst [vmem:[%s3284_s24 + $0x38] sm:$0xff] %v1689_v35 }
 0x62e   : > { %1729 = vst [vmem:[%s3284_s24 + $0x28] sm:$0xff] %v1681_v37 }
 0x630   : > { %v2322_v38 = vpop.f32.mrb[40].mxu1 }
 0x631   : > { %v1702_v39 = vadd.f32 %v2322_v38, %v2020_v21  ;;  %v1693_v40 = vpop.f32.mrb[41].mxu1 }
 0x632   : > { %v1694_v41 = vadd.f32 %v2020_v21, %v1693_v40  ;;  %v2323_v42 = vpop.f32.mrb[42].mxu1 }
 0x633   : > { %1734 = vst [vmem:[%s3284_s24 + $0x50] sm:$0xff] %v1702_v39  ;;  %v1705_v43 = vadd.f32 %v2323_v42, %v2020_v21  ;;  %v1696_v44 = vpop.f32.mrb[43].mxu1 }
 0x634   : > { %1732 = vst [vmem:[%s3284_s24 + $0x40] sm:$0xff] %v1694_v41  ;;  %v1697_v45 = vadd.f32 %v2020_v21, %v1696_v44 }
 0x635   : > { %1735 = vst [vmem:[%s3284_s24 + $0x58] sm:$0xff] %v1705_v43 }
 0x636   : > { %1733 = vst [vmem:[%s3284_s24 + $0x48] sm:$0xff] %v1697_v45 }
 0x638   : > { %v2326_v46 = vpop.f32.mrb[44].mxu1 }
 0x639   : > { %v1718_v47 = vadd.f32 %v2326_v46, %v2020_v21  ;;  %v1709_v48 = vpop.f32.mrb[45].mxu1 }
 0x63a   : > { %v1710_v49 = vadd.f32 %v2020_v21, %v1709_v48  ;;  %v2327_v50 = vpop.f32.mrb[46].mxu1 }
 0x63b   : > { %1738 = vst [vmem:[%s3284_s24 + $0x70] sm:$0xff] %v1718_v47  ;;  %v1721_v51 = vadd.f32 %v2327_v50, %v2020_v21  ;;  %v1712_v52 = vpop.f32.mrb[47].mxu1 }
 0x63c   : > { %1736 = vst [vmem:[%s3284_s24 + $0x60] sm:$0xff] %v1710_v49  ;;  %v1713_v53 = vadd.f32 %v2020_v21, %v1712_v52 }
 0x63d   : > { %1739 = vst [vmem:[%s3284_s24 + $0x78] sm:$0xff] %v1721_v51 }
 0x63e   : > { %1737 = vst [vmem:[%s3284_s24 + $0x68] sm:$0xff] %v1713_v53 }
 0x63f   : > { %2733 = shalt.err (!%p2730_p11)
}
 0x640   : > { %s2734_s24 = scalar_lea.hbm %s3306_s20, 2048  ;;  %s2738_s14 = scalar_lea.hbm %s3410_s18, 4096 }
 0x641   : > { %p2735_p3 = scmp.ne.s32.totalorder %s3306_s20, %s2734_s24  ;;  %p2739_p6 = scmp.lt.u32.totalorder %s3306_s20, %s3410_s18 }
 0x642   : > { %p2740_p12 = scmp.lt.u32.totalorder %s2738_s14, %s2734_s24  ;;  %p2742_p13 = scmp.lt.u32.totalorder %s2734_s24, %s3306_s20 }
 0x643   : > { %p2736_p5 = pnand %p2735_p3, %p3407_p9 }
 0x644   : > { %p2741_p1 = por %p2740_p12, %p2739_p6 }
 0x645   : > { %p2737_p7 = pneg %p2736_p5 }
 0x646   : > { %p2743_p0 = por %p2742_p13, %p2741_p1 }
 0x648   : > { %p2744_p2 = pnand %p2743_p0, %p2737_p7 }
 0x64a   : > { %2747 = shalt.err (!%p2744_p2)
}
 0x64b   : > { %s3411_s12 = smov 128  }
 0x64c   : > { %2354 = dma.vmem_to_hbm [thread:$0]  (%p3407_p9), %s3308_s22, 2048, %s3306_s20, %s1757_s27, %s3411_s12, %s3411_s12, %s2817_s26  }
 0x64d PF: > { %s1806_s10 = sand.u32 1, %s2790_s29   ;;  %p3412_p8 = scmp.ne.s32.totalorder %s3394_s28, 0 }
 0x64e   : > { %p3413_p4 = scmp.ge.s32.totalorder %s2802_s16, 2  ;;  %s1807_s24 = scalar_lea.sflag [#allocation4], %s1806_s10 }
 0x650   : > { %p2382_p10 = pnand %p3413_p4, %p3412_p8 }
 0x652   : > { %2781 = dma.done.wait (!%p2382_p10), %s1807_s24, 2048  }
 0x653   : > { %2783 = vsyncadd (!%p2382_p10), %s1807_s24, 4294965248  ;;  %s1816_s6 = scalar_lea.sflag [#allocation16], %s1806_s10 }
 0x654   : > { %2785 = dma.done.wait (!%p2382_p10), %s1816_s6, 2048  }
 0x655   : > { %2787 = vsyncadd (!%p2382_p10), %s1816_s6, 4294965248  ;;  %p34_p9 = scmp.ge.s32.totalorder %s3088_s21, 4   ;;  %s3414_s29 = smov %s2794_s30 }
 0x656   : > { %s3415_s30 = smov %s2798_s15  ;;  %s3416_s15 = smov %s3099_s8 }
 0x657   : > { %s3417_s16 = smov %s3088_s21  ;;  %36 = sbr.rel (!%p34_p9) target bundleno = 18 (0x12), region = 158 }
 0x65e   :  { %1821 = vsyncpa [#allocation3], 1 }
 0x65f   :  { %1823 = vsyncpa [#allocation3 + $0x1], 1 }
 0x660   :  { %1824 = vsyncpa [#allocation6], 1 }
 0x661   :  { %1825 = vsyncpa [#allocation9], 1 }
 0x662   :  { %1826 = vsyncpa [#allocation12], 1 }
 0x663   :  { %1827 = vsyncpa [#allocation4], 1 }
 0x664   :  { %1829 = vsyncpa [#allocation4 + $0x1], 1 }
 0x665   :  { %1830 = vsyncpa [#allocation16], 1 }
 0x666   :  { %1832 = vsyncpa [#allocation16 + $0x1], 1 }

</bundles_post_ra>
